<compile_context>
chip_gen: v5e
topology: v5e:2x2
jax: 0.10.0
libtpu: 0.0.40
codegen_flags: <defaults>
</compile_context>

<pallas_src>
import functools

import jax
import jax.numpy as jnp
from jax.experimental import pallas as pl
from jax.experimental.pallas import tpu as pltpu


# ---------------------------------------------------------------------------
# tiling helpers
# ---------------------------------------------------------------------------

def _pick_tile(dim, candidates=(512, 256, 128)):
    """Largest MXU-friendly tile that evenly divides `dim`; fall back to the full dim.

    TODO(synk): for real vocab/sequence sizes that are not multiples of 128, pad the
    dimension (or use pl.cdiv grids with masked edge tiles) instead of falling back to
    one giant block.
    """
    for c in candidates:
        if c <= dim and dim % c == 0:
            return c
    return dim


# ---------------------------------------------------------------------------
# fused RMSNorm + Linear kernel
# (norm needs the full feature row, so K is untiled; the normalized row-block is
#  computed once per i and cached in VMEM, then reused across all N-tiles)
# ---------------------------------------------------------------------------

def _rms_linear_kernel(x_ref, g_ref, w_ref, b_ref, o_ref, xn_ref, *, scale):
    @pl.when(pl.program_id(1) == 0)
    def _normalize():
        x = x_ref[...].astype(jnp.float32)                 # (tm, K)
        norm = jnp.sqrt(jnp.sum(x * x, axis=-1, keepdims=True))
        xn = (x / jnp.maximum(norm, 1e-12)) * scale * g_ref[...].astype(jnp.float32)
        xn_ref[...] = xn.astype(jnp.bfloat16)

    o_ref[...] = (jnp.dot(xn_ref[...], w_ref[...].astype(jnp.bfloat16),
                          preferred_element_type=jnp.float32)
                  + b_ref[...].astype(jnp.float32)).astype(o_ref.dtype)


def rms_linear(x2d, gamma, w, b=None):
    """out = Linear(RMSNorm(x)) with the norm fused (and hoisted) into the matmul."""
    M, K = x2d.shape
    N = w.shape[1]
    if b is None:
        b = jnp.zeros((N,), jnp.float32)
    tm = _pick_tile(M, (256, 128))
    tn = _pick_tile(N, (512, 256, 128))
    kernel = functools.partial(_rms_linear_kernel, scale=float(K) ** 0.5)
    return pl.pallas_call(
        kernel,
        out_shape=jax.ShapeDtypeStruct((M, N), jnp.float32),
        grid=(M // tm, N // tn),
        in_specs=[pl.BlockSpec((tm, K), lambda i, j: (i, 0)),
                  pl.BlockSpec((1, K), lambda i, j: (0, 0)),
                  pl.BlockSpec((K, tn), lambda i, j: (0, j)),
                  pl.BlockSpec((1, tn), lambda i, j: (0, j))],
        out_specs=pl.BlockSpec((tm, tn), lambda i, j: (i, j)),
        scratch_shapes=[pltpu.VMEM((tm, K), jnp.bfloat16)],      # cached normalized rows
        compiler_params=pltpu.CompilerParams(
            dimension_semantics=("parallel", "arbitrary")),
    )(x2d, gamma.reshape(1, K), w, b.reshape(1, N))


# ---------------------------------------------------------------------------
# tiled Linear kernel: K-axis accumulation directly into the resident output block,
# bias + residual fused into the epilogue (bf16 MXU inputs, f32 accumulation)
# ---------------------------------------------------------------------------

def _linear_residual_kernel(x_ref, w_ref, b_ref, res_ref, o_ref):
    k = pl.program_id(2)

    @pl.when(k == 0)
    def _init():
        o_ref[...] = jnp.zeros(o_ref.shape, jnp.float32)

    o_ref[...] += jnp.dot(x_ref[...].astype(jnp.bfloat16),
                          w_ref[...].astype(jnp.bfloat16),
                          preferred_element_type=jnp.float32)

    @pl.when(k == pl.num_programs(2) - 1)
    def _finalize():
        o_ref[...] += b_ref[...].astype(jnp.float32) + res_ref[...].astype(jnp.float32)


def linear(x2d, w, b=None, residual=None):
    M, K = x2d.shape
    N = w.shape[1]
    if b is None:
        b = jnp.zeros((N,), jnp.float32)
    if residual is None:
        residual = jnp.zeros((M, N), jnp.float32)
    tm = _pick_tile(M, (512, 256, 128))
    tn = _pick_tile(N, (512, 256, 128))
    tk = _pick_tile(K, (512, 256, 128))
    return pl.pallas_call(
        _linear_residual_kernel,
        out_shape=jax.ShapeDtypeStruct((M, N), jnp.float32),
        grid=(M // tm, N // tn, K // tk),
        in_specs=[pl.BlockSpec((tm, tk), lambda i, j, k: (i, k)),
                  pl.BlockSpec((tk, tn), lambda i, j, k: (k, j)),
                  pl.BlockSpec((1, tn), lambda i, j, k: (0, j)),
                  pl.BlockSpec((tm, tn), lambda i, j, k: (i, j))],
        out_specs=pl.BlockSpec((tm, tn), lambda i, j, k: (i, j)),
        compiler_params=pltpu.CompilerParams(
            dimension_semantics=("parallel", "parallel", "arbitrary")),
    )(x2d, w, b.reshape(1, N), residual)


# ---------------------------------------------------------------------------
# flash-attention kernel over a (B*H, N, Dh) layout:
#   grid = (B*H, Nq/blk, Nk/blk); online softmax in VMEM scratch;
#   future KV tiles are neither fetched (clamped index_map) nor computed (pl.when);
#   causal mask only built on the diagonal tile.
# ---------------------------------------------------------------------------

def _flash_attn_kernel(q_ref, k_ref, v_ref, o_ref, m_ref, l_ref, acc_ref):
    qi = pl.program_id(1)
    ki = pl.program_id(2)
    neg_big = -jnp.finfo(jnp.float32).max

    @pl.when(ki == 0)
    def _init():
        m_ref[...] = jnp.full(m_ref.shape, -jnp.inf, jnp.float32)
        l_ref[...] = jnp.zeros(l_ref.shape, jnp.float32)
        acc_ref[...] = jnp.zeros(acc_ref.shape, jnp.float32)

    def _scores():
        return jax.lax.dot_general(
            q_ref[...].astype(jnp.bfloat16), k_ref[...].astype(jnp.bfloat16),
            (((1,), (1,)), ((), ())), preferred_element_type=jnp.float32)   # (blk, blk)

    def _update(s):
        m_prev = m_ref[...]                                                  # (blk, 1)
        m_new = jnp.maximum(m_prev, jnp.max(s, axis=-1, keepdims=True))
        alpha = jnp.exp(m_prev - m_new)
        p = jnp.exp(s - m_new)
        l_ref[...] = alpha * l_ref[...] + jnp.sum(p, axis=-1, keepdims=True)
        acc_ref[...] = alpha * acc_ref[...] + jnp.dot(
            p.astype(jnp.bfloat16), v_ref[...].astype(jnp.bfloat16),
            preferred_element_type=jnp.float32)
        m_ref[...] = m_new

    @pl.when(ki < qi)                 # fully-visible KV tile: no mask work at all
    def _off_diag():
        _update(_scores())

    @pl.when(ki == qi)                # diagonal tile: apply the causal mask locally
    def _diag():
        blk = q_ref.shape[0]
        row = jax.lax.broadcasted_iota(jnp.int32, (blk, blk), 0)
        col = jax.lax.broadcasted_iota(jnp.int32, (blk, blk), 1)
        _update(jnp.where(col <= row, _scores(), neg_big))

    @pl.when(ki == pl.num_programs(2) - 1)
    def _finalize():
        o_ref[...] = (acc_ref[...] / l_ref[...]).astype(o_ref.dtype)   # exact divide


def flash_attention(q, k, v):
    """q, k, v: (B*H, N, Dh) bf16, q pre-scaled & rotated, k rotated. Returns bf16."""
    BH, N, Dh = q.shape
    block = _pick_tile(N, (256, 128))   # capped at 256 so double-buffered tiles fit v7x VMEM
    nblk = N // block
    q_spec = pl.BlockSpec((None, block, Dh), lambda b, qi, ki: (b, qi, 0))
    # Clamp the KV block index so tiles strictly in the future are never DMA'd
    # (Pallas skips the copy when the block index is unchanged between steps).
    kv_spec = pl.BlockSpec((None, block, Dh),
                           lambda b, qi, ki: (b, jnp.minimum(ki, qi), 0))
    return pl.pallas_call(
        _flash_attn_kernel,
        out_shape=jax.ShapeDtypeStruct((BH, N, Dh), jnp.bfloat16),
        grid=(BH, nblk, nblk),
        in_specs=[q_spec, kv_spec, kv_spec],
        out_specs=q_spec,
        scratch_shapes=[pltpu.VMEM((block, 1), jnp.float32),   # running max
                        pltpu.VMEM((block, 1), jnp.float32),   # running denom
                        pltpu.VMEM((block, Dh), jnp.float32)], # output accumulator
        compiler_params=pltpu.CompilerParams(
            dimension_semantics=("parallel", "parallel", "arbitrary")),
    )(q, k, v)


# ---------------------------------------------------------------------------
# JAX glue (embedding gather, rotary, gated GELU, head split/merge)
# ---------------------------------------------------------------------------

def rotary_cos_sin(n, dim_head, theta=10000.0):
    # rotary-embedding-torch defaults: interleaved (GPT-J style) pairing, freq repeated x2.
    freqs = 1.0 / (theta ** (jnp.arange(0, dim_head, 2, dtype=jnp.float32) / dim_head))
    t = jnp.arange(n, dtype=jnp.float32)
    angles = jnp.einsum('i,j->ij', t, freqs)          # (n, dh/2)
    angles = jnp.repeat(angles, 2, axis=-1)           # (n, dh), interleaved duplication
    return jnp.cos(angles), jnp.sin(angles)


def apply_rotary(x, cos, sin):
    # x: (B, H, N, Dh); adjacent-pair rotate_half: (x0, x1) -> (-x1, x0)
    # TODO(synk): could be fused into the attention kernel prologue via pltpu.roll + sign
    # mask; kept in XLA glue for lowering safety.
    x_even = x[..., 0::2]
    x_odd = x[..., 1::2]
    rot = jnp.stack((-x_odd, x_even), axis=-1).reshape(x.shape)
    return x * cos + rot * sin


def init_params(key, *, num_tokens, dim, depth, dim_head, heads, ff_mult=4):
    dim_inner = dim_head * heads
    ff_inner = int(ff_mult * dim * 2 / 3)
    keys = iter(jax.random.split(key, 4 + depth * 8))

    def w(shape, scale, dtype=jnp.bfloat16):   # weights stored bf16 in HBM
        return (jax.random.normal(next(keys), shape, jnp.float32) * scale).astype(dtype)

    params = dict(
        token_emb=w((num_tokens, dim), 1.0, jnp.float32),
        final_gamma=jnp.ones((dim,), jnp.float32),
        logits_w=w((dim, num_tokens), dim ** -0.5),
        logits_b=w((num_tokens,), 0.02, jnp.float32),
        layers=[],
    )
    for _ in range(depth):
        params['layers'].append(dict(
            attn_gamma=jnp.ones((dim,), jnp.float32),
            qkv_w=w((dim, dim_inner * 3), dim ** -0.5),      # to_qkv (bias=False)
            out_w=w((dim_inner, dim), dim_inner ** -0.5),    # to_out (bias=False)
            ff_gamma=jnp.ones((dim,), jnp.float32),
            in_w=w((dim, ff_inner * 2), dim ** -0.5),
            in_b=w((ff_inner * 2,), 0.02, jnp.float32),
            out2_w=w((ff_inner, dim), ff_inner ** -0.5),
            out2_b=w((dim,), 0.02, jnp.float32),
        ))
    return params


def infini_transformer_forward(tokens, params, *, dim_head, heads):
    B, N = tokens.shape
    emb = params['token_emb']
    dim = emb.shape[1]
    dim_inner = dim_head * heads
    scale = dim_head ** -0.5

    # TODO(synk): embedding gather kept as XLA glue (row gather; no benefit as a Pallas kernel).
    x = jnp.take(emb, tokens, axis=0)                     # (B, N, dim) f32
    cos, sin = rotary_cos_sin(N, dim_head)

    x2d = x.reshape(B * N, dim)
    cached_kvs = []
    for lp in params['layers']:
        # ---- causal attention block (RMSNorm fused into the qkv projection) ----
        qkv = rms_linear(x2d, lp['attn_gamma'], lp['qkv_w'])                 # (B*N, 3*H*Dh)
        qkv = qkv.reshape(B, N, 3, heads, dim_head).transpose(2, 0, 3, 1, 4)  # (3,B,H,N,Dh)
        q, k, v = qkv[0], qkv[1], qkv[2]

        # cached_kv = torch.stack((k, v)), shape (2, B, H, N, Dh), pre-rotation k (as reference)
        cached_kvs.append(jnp.stack((k, v)))

        q_rot = apply_rotary(q * scale, cos, sin)         # q scaled then rotated
        k_rot = apply_rotary(k, cos, sin)

        attn = flash_attention(
            q_rot.reshape(B * heads, N, dim_head).astype(jnp.bfloat16),
            k_rot.reshape(B * heads, N, dim_head).astype(jnp.bfloat16),
            v.reshape(B * heads, N, dim_head).astype(jnp.bfloat16))          # (B*H, N, Dh) bf16
        attn = attn.reshape(B, heads, N, dim_head).transpose(0, 2, 1, 3)     # merge heads
        attn = attn.reshape(B * N, dim_inner)

        # out projection with the residual add fused into the matmul epilogue
        x2d = linear(attn, lp['out_w'], residual=x2d)

        # ---- gated GELU feedforward block (RMSNorm fused into proj_in) ----
        h = rms_linear(x2d, lp['ff_gamma'], lp['in_w'], lp['in_b'])
        x_part, gates = jnp.split(h, 2, axis=-1)
        # TODO(synk): exact-erf GELU gating kept in XLA glue; erf lowering in Mosaic is not
        # guaranteed and tanh-GELU would change numerics vs the PyTorch reference.
        h_act = (jax.nn.gelu(gates, approximate=False) * x_part).astype(jnp.bfloat16)
        x2d = linear(h_act, lp['out2_w'], lp['out2_b'], residual=x2d)

    # final RMSNorm fused into the logits projection
    logits = rms_linear(x2d, params['final_gamma'], params['logits_w'], params['logits_b'])
    # TransformerReturn(logits, cached_kvs, past_memories)
    return logits.reshape(B, N, -1), cached_kvs, None


if __name__ == "__main__":
    B, N = 2, 8
    num_tokens, dim, depth, dim_head, heads = 64, 32, 2, 16, 2

    key = jax.random.PRNGKey(0)
    pkey, tkey = jax.random.split(key)
    params = init_params(pkey, num_tokens=num_tokens, dim=dim, depth=depth,
                         dim_head=dim_head, heads=heads)
    tokens = jax.random.randint(tkey, (B, N), 0, num_tokens, dtype=jnp.int32)

    fwd = jax.jit(functools.partial(infini_transformer_forward,
                                    dim_head=dim_head, heads=heads))
    logits, cached_kvs, past_memories = fwd(tokens, params)
    jax.block_until_ready(logits)
    jax.block_until_ready(cached_kvs)

    assert logits.shape == (B, N, num_tokens)
    assert all(kv.shape == (2, B, heads, N, dim_head) for kv in cached_kvs)
    assert past_memories is None
    print("KERNEL_OK")
</pallas_src>

<mosaic_0001>
module attributes {stable_mosaic.version = 11 : i64} {
  func.func @_rms_linear_kernel(%arg0: i32, %arg1: i32, %arg2: memref<16x32xf32, #tpu.memory_space<vmem>>, %arg3: memref<1x32xf32, #tpu.memory_space<vmem>>, %arg4: memref<32x96xbf16, #tpu.memory_space<vmem>>, %arg5: memref<1x96xf32, #tpu.memory_space<vmem>>, %arg6: memref<16x96xf32, #tpu.memory_space<vmem>>, %arg7: memref<16x32xbf16, #tpu.memory_space<vmem>>) attributes {dimension_semantics = [#tpu.dimension_semantics<parallel>, #tpu.dimension_semantics<arbitrary>], iteration_bounds = array<i64: 1, 1>, scalar_prefetch = 0 : i64, scratch_operands = 1 : i64, tpu.core_type = #tpu.core_type<tc>, window_params = [{transform_indices = @transform_0, window_bounds = array<i64: 16, 32>}, {pipeline_mode = #tpu.pipeline_mode<synchronous>, transform_indices = @transform_1, window_bounds = array<i64: 1, 32>}, {transform_indices = @transform_2, window_bounds = array<i64: 32, 96>}, {transform_indices = @transform_3, window_bounds = array<i64: 1, 96>}, {transform_indices = @transform_4, window_bounds = array<i64: 16, 96>}]} {
    %c0_i32 = arith.constant 0 : i32
    %0 = arith.cmpi eq, %arg1, %c0_i32 : i32
    %1 = arith.extui %0 : i1 to i32
    %c0_i32_0 = arith.constant 0 : i32
    %2 = arith.cmpi ne, %1, %c0_i32_0 : i32
    scf.if %2 {
      %c0_8 = arith.constant 0 : index
      %c0_9 = arith.constant 0 : index
      %10 = vector.load %arg2[%c0_8, %c0_9] : memref<16x32xf32, #tpu.memory_space<vmem>>, vector<16x32xf32>
      %11 = arith.mulf %10, %10 : vector<16x32xf32>
      %cst_10 = arith.constant dense<0.000000e+00> : vector<16xf32>
      %12 = vector.multi_reduction <add>, %11, %cst_10 [1] : vector<16x32xf32> to vector<16xf32>
      %13 = vector.shape_cast %12 : vector<16xf32> to vector<16x1xf32>
      %14 = math.sqrt %13 : vector<16x1xf32>
      %cst_11 = arith.constant 9.99999996E-13 : f32
      %15 = vector.broadcast %cst_11 : f32 to vector<16x1xf32>
      %16 = arith.maximumf %14, %15 : vector<16x1xf32>
      %17 = vector.broadcast %16 : vector<16x1xf32> to vector<16x32xf32>
      %18 = arith.divf %10, %17 : vector<16x32xf32>
      %cst_12 = arith.constant 5.65685415 : f32
      %19 = vector.broadcast %cst_12 : f32 to vector<16x32xf32>
      %20 = arith.mulf %18, %19 : vector<16x32xf32>
      %c0_13 = arith.constant 0 : index
      %c0_14 = arith.constant 0 : index
      %21 = vector.load %arg3[%c0_13, %c0_14] : memref<1x32xf32, #tpu.memory_space<vmem>>, vector<1x32xf32>
      %22 = vector.broadcast %21 : vector<1x32xf32> to vector<16x32xf32>
      %23 = arith.mulf %20, %22 : vector<16x32xf32>
      %24 = arith.truncf %23 : vector<16x32xf32> to vector<16x32xbf16>
      %c0_15 = arith.constant 0 : index
      %c0_16 = arith.constant 0 : index
      %25 = vector.load %arg7[%c0_15, %c0_16] : memref<16x32xbf16, #tpu.memory_space<vmem>>, vector<16x32xbf16>
      tpu.vector_store %arg7[%c0_15, %c0_16], %24 {strides = array<i32>} : memref<16x32xbf16, #tpu.memory_space<vmem>>, vector<16x32xbf16>,
    } else {
    }
    %c0 = arith.constant 0 : index
    %c0_1 = arith.constant 0 : index
    %3 = vector.load %arg7[%c0, %c0_1] : memref<16x32xbf16, #tpu.memory_space<vmem>>, vector<16x32xbf16>
    %c0_2 = arith.constant 0 : index
    %c0_3 = arith.constant 0 : index
    %4 = vector.load %arg4[%c0_2, %c0_3] : memref<32x96xbf16, #tpu.memory_space<vmem>>, vector<32x96xbf16>
    %cst = arith.constant dense<0.000000e+00> : vector<16x96xf32>
    %5 = tpu.matmul %3, %4, %cst {dimension_numbers = #tpu.dot_dimension_numbers<[1], [0], [0], [1], [0, 0, 1, 1], [], []>} : vector<16x32xbf16>, vector<32x96xbf16>, vector<16x96xf32> -> vector<16x96xf32>
    %c0_4 = arith.constant 0 : index
    %c0_5 = arith.constant 0 : index
    %6 = vector.load %arg5[%c0_4, %c0_5] : memref<1x96xf32, #tpu.memory_space<vmem>>, vector<1x96xf32>
    %7 = vector.broadcast %6 : vector<1x96xf32> to vector<16x96xf32>
    %8 = arith.addf %5, %7 : vector<16x96xf32>
    %c0_6 = arith.constant 0 : index
    %c0_7 = arith.constant 0 : index
    %9 = vector.load %arg6[%c0_6, %c0_7] : memref<16x96xf32, #tpu.memory_space<vmem>>, vector<16x96xf32>
    tpu.vector_store %arg6[%c0_6, %c0_7], %8 {strides = array<i32>} : memref<16x96xf32, #tpu.memory_space<vmem>>, vector<16x96xf32>,
    return
  }
  func.func @transform_0(%arg0: i32, %arg1: i32) -> (i32, i32) {
    %c0_i32 = arith.constant 0 : i32
    %c0_i32_0 = arith.constant 0 : i32
    return %arg0, %c0_i32 : i32, i32
  }
  func.func @transform_1(%arg0: i32, %arg1: i32) -> (i32, i32) {
    %c0_i32 = arith.constant 0 : i32
    %c0_i32_0 = arith.constant 0 : i32
    %c0_i32_1 = arith.constant 0 : i32
    return %c0_i32, %c0_i32_0 : i32, i32
  }
  func.func @transform_2(%arg0: i32, %arg1: i32) -> (i32, i32) {
    %c0_i32 = arith.constant 0 : i32
    %c0_i32_0 = arith.constant 0 : i32
    return %c0_i32, %arg1 : i32, i32
  }
  func.func @transform_3(%arg0: i32, %arg1: i32) -> (i32, i32) {
    %c0_i32 = arith.constant 0 : i32
    %c0_i32_0 = arith.constant 0 : i32
    return %c0_i32, %arg1 : i32, i32
  }
  func.func @transform_4(%arg0: i32, %arg1: i32) -> (i32, i32) {
    %c0_i32 = arith.constant 0 : i32
    return %arg0, %arg1 : i32, i32
  }
}

module attributes {stable_mosaic.version = 11 : i64} {
  func.func @_flash_attn_kernel(%arg0: i32, %arg1: i32, %arg2: i32, %arg3: memref<1x8x16xbf16, #tpu.memory_space<vmem>>, %arg4: memref<1x8x16xbf16, #tpu.memory_space<vmem>>, %arg5: memref<1x8x16xbf16, #tpu.memory_space<vmem>>, %arg6: memref<1x8x16xbf16, #tpu.memory_space<vmem>>, %arg7: memref<8x1xf32, #tpu.memory_space<vmem>>, %arg8: memref<8x1xf32, #tpu.memory_space<vmem>>, %arg9: memref<8x16xf32, #tpu.memory_space<vmem>>) attributes {dimension_semantics = [#tpu.dimension_semantics<parallel>, #tpu.dimension_semantics<parallel>, #tpu.dimension_semantics<arbitrary>], iteration_bounds = array<i64: 4, 1, 1>, scalar_prefetch = 0 : i64, scratch_operands = 3 : i64, tpu.core_type = #tpu.core_type<tc>, window_params = [{transform_indices = @transform_0, window_bounds = array<i64: 1, 8, 16>}, {transform_indices = @transform_1, window_bounds = array<i64: 1, 8, 16>}, {transform_indices = @transform_2, window_bounds = array<i64: 1, 8, 16>}, {transform_indices = @transform_3, window_bounds = array<i64: 1, 8, 16>}]} {
    %c0_i32 = arith.constant 0 : i32
    %0 = arith.cmpi eq, %arg2, %c0_i32 : i32
    %1 = arith.extui %0 : i1 to i32
    %c0_i32_0 = arith.constant 0 : i32
    %2 = arith.cmpi ne, %1, %c0_i32_0 : i32
    scf.if %2 {
      %cst = arith.constant 0xFF800000 : f32
      %12 = vector.broadcast %cst : f32 to vector<8x1xf32>
      %c0 = arith.constant 0 : index
      %c0_5 = arith.constant 0 : index
      %13 = vector.load %arg7[%c0, %c0_5] : memref<8x1xf32, #tpu.memory_space<vmem>>, vector<8x1xf32>
      tpu.vector_store %arg7[%c0, %c0_5], %12 {strides = array<i32>} : memref<8x1xf32, #tpu.memory_space<vmem>>, vector<8x1xf32>,
      %cst_6 = arith.constant 0.000000e+00 : f32
      %14 = vector.broadcast %cst_6 : f32 to vector<8x1xf32>
      %c0_7 = arith.constant 0 : index
      %c0_8 = arith.constant 0 : index
      %15 = vector.load %arg8[%c0_7, %c0_8] : memref<8x1xf32, #tpu.memory_space<vmem>>, vector<8x1xf32>
      tpu.vector_store %arg8[%c0_7, %c0_8], %14 {strides = array<i32>} : memref<8x1xf32, #tpu.memory_space<vmem>>, vector<8x1xf32>,
      %cst_9 = arith.constant 0.000000e+00 : f32
      %16 = vector.broadcast %cst_9 : f32 to vector<8x16xf32>
      %c0_10 = arith.constant 0 : index
      %c0_11 = arith.constant 0 : index
      %17 = vector.load %arg9[%c0_10, %c0_11] : memref<8x16xf32, #tpu.memory_space<vmem>>, vector<8x16xf32>
      tpu.vector_store %arg9[%c0_10, %c0_11], %16 {strides = array<i32>} : memref<8x16xf32, #tpu.memory_space<vmem>>, vector<8x16xf32>,
    } else {
    }
    %3 = arith.cmpi slt, %arg2, %arg1 : i32
    %4 = arith.extui %3 : i1 to i32
    %c0_i32_1 = arith.constant 0 : i32
    %5 = arith.cmpi ne, %4, %c0_i32_1 : i32
    scf.if %5 {
      %c0 = arith.constant 0 : index
      %c0_5 = arith.constant 0 : index
      %c0_6 = arith.constant 0 : index
      %12 = vector.load %arg3[%c0, %c0_5, %c0_6] : memref<1x8x16xbf16, #tpu.memory_space<vmem>>, vector<1x8x16xbf16>
      %13 = vector.shape_cast %12 : vector<1x8x16xbf16> to vector<8x16xbf16>
      %c0_7 = arith.constant 0 : index
      %c0_8 = arith.constant 0 : index
      %c0_9 = arith.constant 0 : index
      %14 = vector.load %arg4[%c0_7, %c0_8, %c0_9] : memref<1x8x16xbf16, #tpu.memory_space<vmem>>, vector<1x8x16xbf16>
      %15 = vector.shape_cast %14 : vector<1x8x16xbf16> to vector<8x16xbf16>
      %cst = arith.constant dense<0.000000e+00> : vector<8x8xf32>
      %16 = tpu.matmul %13, %15, %cst {dimension_numbers = #tpu.dot_dimension_numbers<[1], [1], [0], [0], [0, 0, 1, 0], [], []>} : vector<8x16xbf16>, vector<8x16xbf16>, vector<8x8xf32> -> vector<8x8xf32>
      %c0_10 = arith.constant 0 : index
      %c0_11 = arith.constant 0 : index
      %17 = vector.load %arg7[%c0_10, %c0_11] : memref<8x1xf32, #tpu.memory_space<vmem>>, vector<8x1xf32>
      %cst_12 = arith.constant dense<0xFF800000> : vector<8xf32>
      %18 = vector.multi_reduction <maximumf>, %16, %cst_12 [1] : vector<8x8xf32> to vector<8xf32>
      %19 = vector.shape_cast %18 : vector<8xf32> to vector<8x1xf32>
      %20 = arith.maximumf %17, %19 : vector<8x1xf32>
      %21 = arith.subf %17, %20 : vector<8x1xf32>
      %22 = math.exp %21 : vector<8x1xf32>
      %23 = vector.broadcast %20 : vector<8x1xf32> to vector<8x8xf32>
      %24 = arith.subf %16, %23 : vector<8x8xf32>
      %25 = math.exp %24 : vector<8x8xf32>
      %c0_13 = arith.constant 0 : index
      %c0_14 = arith.constant 0 : index
      %26 = vector.load %arg8[%c0_13, %c0_14] : memref<8x1xf32, #tpu.memory_space<vmem>>, vector<8x1xf32>
      %27 = arith.mulf %22, %26 : vector<8x1xf32>
      %cst_15 = arith.constant dense<0.000000e+00> : vector<8xf32>
      %28 = vector.multi_reduction <add>, %25, %cst_15 [1] : vector<8x8xf32> to vector<8xf32>
      %29 = vector.shape_cast %28 : vector<8xf32> to vector<8x1xf32>
      %30 = arith.addf %27, %29 : vector<8x1xf32>
      %c0_16 = arith.constant 0 : index
      %c0_17 = arith.constant 0 : index
      %31 = vector.load %arg8[%c0_16, %c0_17] : memref<8x1xf32, #tpu.memory_space<vmem>>, vector<8x1xf32>
      tpu.vector_store %arg8[%c0_16, %c0_17], %30 {strides = array<i32>} : memref<8x1xf32, #tpu.memory_space<vmem>>, vector<8x1xf32>,
      %c0_18 = arith.constant 0 : index
      %c0_19 = arith.constant 0 : index
      %32 = vector.load %arg9[%c0_18, %c0_19] : memref<8x16xf32, #tpu.memory_space<vmem>>, vector<8x16xf32>
      %33 = vector.broadcast %22 : vector<8x1xf32> to vector<8x16xf32>
      %34 = arith.mulf %33, %32 : vector<8x16xf32>
      %35 = arith.truncf %25 : vector<8x8xf32> to vector<8x8xbf16>
      %c0_20 = arith.constant 0 : index
      %c0_21 = arith.constant 0 : index
      %c0_22 = arith.constant 0 : index
      %36 = vector.load %arg5[%c0_20, %c0_21, %c0_22] : memref<1x8x16xbf16, #tpu.memory_space<vmem>>, vector<1x8x16xbf16>
      %37 = vector.shape_cast %36 : vector<1x8x16xbf16> to vector<8x16xbf16>
      %cst_23 = arith.constant dense<0.000000e+00> : vector<8x16xf32>
      %38 = tpu.matmul %35, %37, %cst_23 {dimension_numbers = #tpu.dot_dimension_numbers<[1], [0], [0], [1], [0, 0, 1, 1], [], []>} : vector<8x8xbf16>, vector<8x16xbf16>, vector<8x16xf32> -> vector<8x16xf32>
      %39 = arith.addf %34, %38 : vector<8x16xf32>
      %c0_24 = arith.constant 0 : index
      %c0_25 = arith.constant 0 : index
      %40 = vector.load %arg9[%c0_24, %c0_25] : memref<8x16xf32, #tpu.memory_space<vmem>>, vector<8x16xf32>
      tpu.vector_store %arg9[%c0_24, %c0_25], %39 {strides = array<i32>} : memref<8x16xf32, #tpu.memory_space<vmem>>, vector<8x16xf32>,
      %c0_26 = arith.constant 0 : index
      %c0_27 = arith.constant 0 : index
      %41 = vector.load %arg7[%c0_26, %c0_27] : memref<8x1xf32, #tpu.memory_space<vmem>>, vector<8x1xf32>
      tpu.vector_store %arg7[%c0_26, %c0_27], %20 {strides = array<i32>} : memref<8x1xf32, #tpu.memory_space<vmem>>, vector<8x1xf32>,
    } else {
    }
    %6 = arith.cmpi eq, %arg2, %arg1 : i32
    %7 = arith.extui %6 : i1 to i32
    %c0_i32_2 = arith.constant 0 : i32
    %8 = arith.cmpi ne, %7, %c0_i32_2 : i32
    scf.if %8 {
      %12 = tpu.iota {dimensions = array<i32: 0>} : vector<8x8xi32>
      %13 = tpu.iota {dimensions = array<i32: 1>} : vector<8x8xi32>
      %14 = arith.cmpi sle, %13, %12 : vector<8x8xi32>
      %c0 = arith.constant 0 : index
      %c0_5 = arith.constant 0 : index
      %c0_6 = arith.constant 0 : index
      %15 = vector.load %arg3[%c0, %c0_5, %c0_6] : memref<1x8x16xbf16, #tpu.memory_space<vmem>>, vector<1x8x16xbf16>
      %16 = vector.shape_cast %15 : vector<1x8x16xbf16> to vector<8x16xbf16>
      %c0_7 = arith.constant 0 : index
      %c0_8 = arith.constant 0 : index
      %c0_9 = arith.constant 0 : index
      %17 = vector.load %arg4[%c0_7, %c0_8, %c0_9] : memref<1x8x16xbf16, #tpu.memory_space<vmem>>, vector<1x8x16xbf16>
      %18 = vector.shape_cast %17 : vector<1x8x16xbf16> to vector<8x16xbf16>
      %cst = arith.constant dense<0.000000e+00> : vector<8x8xf32>
      %19 = tpu.matmul %16, %18, %cst {dimension_numbers = #tpu.dot_dimension_numbers<[1], [1], [0], [0], [0, 0, 1, 0], [], []>} : vector<8x16xbf16>, vector<8x16xbf16>, vector<8x8xf32> -> vector<8x8xf32>
      %cst_10 = arith.constant -3.40282347E+38 : f32
      %20 = vector.broadcast %cst_10 : f32 to vector<8x8xf32>
      %21 = arith.select %14, %19, %20 : vector<8x8xi1>, vector<8x8xf32>
      %c0_11 = arith.constant 0 : index
      %c0_12 = arith.constant 0 : index
      %22 = vector.load %arg7[%c0_11, %c0_12] : memref<8x1xf32, #tpu.memory_space<vmem>>, vector<8x1xf32>
      %cst_13 = arith.constant dense<0xFF800000> : vector<8xf32>
      %23 = vector.multi_reduction <maximumf>, %21, %cst_13 [1] : vector<8x8xf32> to vector<8xf32>
      %24 = vector.shape_cast %23 : vector<8xf32> to vector<8x1xf32>
      %25 = arith.maximumf %22, %24 : vector<8x1xf32>
      %26 = arith.subf %22, %25 : vector<8x1xf32>
      %27 = math.exp %26 : vector<8x1xf32>
      %28 = vector.broadcast %25 : vector<8x1xf32> to vector<8x8xf32>
      %29 = arith.subf %21, %28 : vector<8x8xf32>
      %30 = math.exp %29 : vector<8x8xf32>
      %c0_14 = arith.constant 0 : index
      %c0_15 = arith.constant 0 : index
      %31 = vector.load %arg8[%c0_14, %c0_15] : memref<8x1xf32, #tpu.memory_space<vmem>>, vector<8x1xf32>
      %32 = arith.mulf %27, %31 : vector<8x1xf32>
      %cst_16 = arith.constant dense<0.000000e+00> : vector<8xf32>
      %33 = vector.multi_reduction <add>, %30, %cst_16 [1] : vector<8x8xf32> to vector<8xf32>
      %34 = vector.shape_cast %33 : vector<8xf32> to vector<8x1xf32>
      %35 = arith.addf %32, %34 : vector<8x1xf32>
      %c0_17 = arith.constant 0 : index
      %c0_18 = arith.constant 0 : index
      %36 = vector.load %arg8[%c0_17, %c0_18] : memref<8x1xf32, #tpu.memory_space<vmem>>, vector<8x1xf32>
      tpu.vector_store %arg8[%c0_17, %c0_18], %35 {strides = array<i32>} : memref<8x1xf32, #tpu.memory_space<vmem>>, vector<8x1xf32>,
      %c0_19 = arith.constant 0 : index
      %c0_20 = arith.constant 0 : index
      %37 = vector.load %arg9[%c0_19, %c0_20] : memref<8x16xf32, #tpu.memory_space<vmem>>, vector<8x16xf32>
      %38 = vector.broadcast %27 : vector<8x1xf32> to vector<8x16xf32>
      %39 = arith.mulf %38, %37 : vector<8x16xf32>
      %40 = arith.truncf %30 : vector<8x8xf32> to vector<8x8xbf16>
      %c0_21 = arith.constant 0 : index
      %c0_22 = arith.constant 0 : index
      %c0_23 = arith.constant 0 : index
      %41 = vector.load %arg5[%c0_21, %c0_22, %c0_23] : memref<1x8x16xbf16, #tpu.memory_space<vmem>>, vector<1x8x16xbf16>
      %42 = vector.shape_cast %41 : vector<1x8x16xbf16> to vector<8x16xbf16>
      %cst_24 = arith.constant dense<0.000000e+00> : vector<8x16xf32>
      %43 = tpu.matmul %40, %42, %cst_24 {dimension_numbers = #tpu.dot_dimension_numbers<[1], [0], [0], [1], [0, 0, 1, 1], [], []>} : vector<8x8xbf16>, vector<8x16xbf16>, vector<8x16xf32> -> vector<8x16xf32>
      %44 = arith.addf %39, %43 : vector<8x16xf32>
      %c0_25 = arith.constant 0 : index
      %c0_26 = arith.constant 0 : index
      %45 = vector.load %arg9[%c0_25, %c0_26] : memref<8x16xf32, #tpu.memory_space<vmem>>, vector<8x16xf32>
      tpu.vector_store %arg9[%c0_25, %c0_26], %44 {strides = array<i32>} : memref<8x16xf32, #tpu.memory_space<vmem>>, vector<8x16xf32>,
      %c0_27 = arith.constant 0 : index
      %c0_28 = arith.constant 0 : index
      %46 = vector.load %arg7[%c0_27, %c0_28] : memref<8x1xf32, #tpu.memory_space<vmem>>, vector<8x1xf32>
      tpu.vector_store %arg7[%c0_27, %c0_28], %25 {strides = array<i32>} : memref<8x1xf32, #tpu.memory_space<vmem>>, vector<8x1xf32>,
    } else {
    }
    %c0_i32_3 = arith.constant 0 : i32
    %9 = arith.cmpi eq, %arg2, %c0_i32_3 : i32
    %10 = arith.extui %9 : i1 to i32
    %c0_i32_4 = arith.constant 0 : i32
    %11 = arith.cmpi ne, %10, %c0_i32_4 : i32
    scf.if %11 {
      %c0 = arith.constant 0 : index
      %c0_5 = arith.constant 0 : index
      %12 = vector.load %arg9[%c0, %c0_5] : memref<8x16xf32, #tpu.memory_space<vmem>>, vector<8x16xf32>
      %c0_6 = arith.constant 0 : index
      %c0_7 = arith.constant 0 : index
      %13 = vector.load %arg8[%c0_6, %c0_7] : memref<8x1xf32, #tpu.memory_space<vmem>>, vector<8x1xf32>
      %14 = vector.broadcast %13 : vector<8x1xf32> to vector<8x16xf32>
      %15 = arith.divf %12, %14 : vector<8x16xf32>
      %16 = arith.truncf %15 : vector<8x16xf32> to vector<8x16xbf16>
      %c0_8 = arith.constant 0 : index
      %c0_9 = arith.constant 0 : index
      %c0_10 = arith.constant 0 : index
      %17 = vector.load %arg6[%c0_8, %c0_9, %c0_10] : memref<1x8x16xbf16, #tpu.memory_space<vmem>>, vector<1x8x16xbf16>
      %18 = vector.shape_cast %17 : vector<1x8x16xbf16> to vector<8x16xbf16>
      %19 = vector.shape_cast %16 : vector<8x16xbf16> to vector<1x8x16xbf16>
      tpu.vector_store %arg6[%c0_8, %c0_9, %c0_10], %19 {strides = array<i32>} : memref<1x8x16xbf16, #tpu.memory_space<vmem>>, vector<1x8x16xbf16>,
    } else {
    }
    return
  }
  func.func @transform_0(%arg0: i32, %arg1: i32, %arg2: i32) -> (i32, i32, i32) {
    %c0_i32 = arith.constant 0 : i32
    %c0_i32_0 = arith.constant 0 : i32
    return %arg0, %arg1, %c0_i32 : i32, i32, i32
  }
  func.func @transform_1(%arg0: i32, %arg1: i32, %arg2: i32) -> (i32, i32, i32) {
    %0 = arith.minsi %arg2, %arg1 : i32
    %c0_i32 = arith.constant 0 : i32
    %c0_i32_0 = arith.constant 0 : i32
    return %arg0, %0, %c0_i32 : i32, i32, i32
  }
  func.func @transform_2(%arg0: i32, %arg1: i32, %arg2: i32) -> (i32, i32, i32) {
    %0 = arith.minsi %arg2, %arg1 : i32
    %c0_i32 = arith.constant 0 : i32
    %c0_i32_0 = arith.constant 0 : i32
    return %arg0, %0, %c0_i32 : i32, i32, i32
  }
  func.func @transform_3(%arg0: i32, %arg1: i32, %arg2: i32) -> (i32, i32, i32) {
    %c0_i32 = arith.constant 0 : i32
    %c0_i32_0 = arith.constant 0 : i32
    return %arg0, %arg1, %c0_i32 : i32, i32, i32
  }
}

module attributes {stable_mosaic.version = 11 : i64} {
  func.func @_linear_residual_kernel(%arg0: i32, %arg1: i32, %arg2: i32, %arg3: memref<16x32xbf16, #tpu.memory_space<vmem>>, %arg4: memref<32x32xbf16, #tpu.memory_space<vmem>>, %arg5: memref<1x32xf32, #tpu.memory_space<vmem>>, %arg6: memref<16x32xf32, #tpu.memory_space<vmem>>, %arg7: memref<16x32xf32, #tpu.memory_space<vmem>>) attributes {dimension_semantics = [#tpu.dimension_semantics<parallel>, #tpu.dimension_semantics<parallel>, #tpu.dimension_semantics<arbitrary>], iteration_bounds = array<i64: 1, 1, 1>, scalar_prefetch = 0 : i64, scratch_operands = 0 : i64, tpu.core_type = #tpu.core_type<tc>, window_params = [{transform_indices = @transform_0, window_bounds = array<i64: 16, 32>}, {transform_indices = @transform_1, window_bounds = array<i64: 32, 32>}, {transform_indices = @transform_2, window_bounds = array<i64: 1, 32>}, {transform_indices = @transform_3, window_bounds = array<i64: 16, 32>}, {transform_indices = @transform_4, window_bounds = array<i64: 16, 32>}]} {
    %c0_i32 = arith.constant 0 : i32
    %0 = arith.cmpi eq, %arg2, %c0_i32 : i32
    %1 = arith.extui %0 : i1 to i32
    %c0_i32_0 = arith.constant 0 : i32
    %2 = arith.cmpi ne, %1, %c0_i32_0 : i32
    scf.if %2 {
      %cst_10 = arith.constant 0.000000e+00 : f32
      %12 = vector.broadcast %cst_10 : f32 to vector<16x32xf32>
      %c0_11 = arith.constant 0 : index
      %c0_12 = arith.constant 0 : index
      %13 = vector.load %arg7[%c0_11, %c0_12] : memref<16x32xf32, #tpu.memory_space<vmem>>, vector<16x32xf32>
      tpu.vector_store %arg7[%c0_11, %c0_12], %12 {strides = array<i32>} : memref<16x32xf32, #tpu.memory_space<vmem>>, vector<16x32xf32>,
    } else {
    }
    %c0 = arith.constant 0 : index
    %c0_1 = arith.constant 0 : index
    %3 = vector.load %arg7[%c0, %c0_1] : memref<16x32xf32, #tpu.memory_space<vmem>>, vector<16x32xf32>
    %c0_2 = arith.constant 0 : index
    %c0_3 = arith.constant 0 : index
    %4 = vector.load %arg3[%c0_2, %c0_3] : memref<16x32xbf16, #tpu.memory_space<vmem>>, vector<16x32xbf16>
    %c0_4 = arith.constant 0 : index
    %c0_5 = arith.constant 0 : index
    %5 = vector.load %arg4[%c0_4, %c0_5] : memref<32x32xbf16, #tpu.memory_space<vmem>>, vector<32x32xbf16>
    %cst = arith.constant dense<0.000000e+00> : vector<16x32xf32>
    %6 = tpu.matmul %4, %5, %cst {dimension_numbers = #tpu.dot_dimension_numbers<[1], [0], [0], [1], [0, 0, 1, 1], [], []>} : vector<16x32xbf16>, vector<32x32xbf16>, vector<16x32xf32> -> vector<16x32xf32>
    %7 = arith.addf %3, %6 : vector<16x32xf32>
    %c0_6 = arith.constant 0 : index
    %c0_7 = arith.constant 0 : index
    %8 = vector.load %arg7[%c0_6, %c0_7] : memref<16x32xf32, #tpu.memory_space<vmem>>, vector<16x32xf32>
    tpu.vector_store %arg7[%c0_6, %c0_7], %7 {strides = array<i32>} : memref<16x32xf32, #tpu.memory_space<vmem>>, vector<16x32xf32>,
    %c0_i32_8 = arith.constant 0 : i32
    %9 = arith.cmpi eq, %arg2, %c0_i32_8 : i32
    %10 = arith.extui %9 : i1 to i32
    %c0_i32_9 = arith.constant 0 : i32
    %11 = arith.cmpi ne, %10, %c0_i32_9 : i32
    scf.if %11 {
      %c0_10 = arith.constant 0 : index
      %c0_11 = arith.constant 0 : index
      %12 = vector.load %arg7[%c0_10, %c0_11] : memref<16x32xf32, #tpu.memory_space<vmem>>, vector<16x32xf32>
      %c0_12 = arith.constant 0 : index
      %c0_13 = arith.constant 0 : index
      %13 = vector.load %arg5[%c0_12, %c0_13] : memref<1x32xf32, #tpu.memory_space<vmem>>, vector<1x32xf32>
      %c0_14 = arith.constant 0 : index
      %c0_15 = arith.constant 0 : index
      %14 = vector.load %arg6[%c0_14, %c0_15] : memref<16x32xf32, #tpu.memory_space<vmem>>, vector<16x32xf32>
      %15 = vector.broadcast %13 : vector<1x32xf32> to vector<16x32xf32>
      %16 = arith.addf %15, %14 : vector<16x32xf32>
      %17 = arith.addf %12, %16 : vector<16x32xf32>
      %c0_16 = arith.constant 0 : index
      %c0_17 = arith.constant 0 : index
      %18 = vector.load %arg7[%c0_16, %c0_17] : memref<16x32xf32, #tpu.memory_space<vmem>>, vector<16x32xf32>
      tpu.vector_store %arg7[%c0_16, %c0_17], %17 {strides = array<i32>} : memref<16x32xf32, #tpu.memory_space<vmem>>, vector<16x32xf32>,
    } else {
    }
    return
  }
  func.func @transform_0(%arg0: i32, %arg1: i32, %arg2: i32) -> (i32, i32) {
    %c0_i32 = arith.constant 0 : i32
    return %arg0, %arg2 : i32, i32
  }
  func.func @transform_1(%arg0: i32, %arg1: i32, %arg2: i32) -> (i32, i32) {
    %c0_i32 = arith.constant 0 : i32
    return %arg2, %arg1 : i32, i32
  }
  func.func @transform_2(%arg0: i32, %arg1: i32, %arg2: i32) -> (i32, i32) {
    %c0_i32 = arith.constant 0 : i32
    %c0_i32_0 = arith.constant 0 : i32
    return %c0_i32, %arg1 : i32, i32
  }
  func.func @transform_3(%arg0: i32, %arg1: i32, %arg2: i32) -> (i32, i32) {
    %c0_i32 = arith.constant 0 : i32
    return %arg0, %arg1 : i32, i32
  }
  func.func @transform_4(%arg0: i32, %arg1: i32, %arg2: i32) -> (i32, i32) {
    %c0_i32 = arith.constant 0 : i32
    return %arg0, %arg1 : i32, i32
  }
}

module attributes {stable_mosaic.version = 11 : i64} {
  func.func @_rms_linear_kernel(%arg0: i32, %arg1: i32, %arg2: memref<16x32xf32, #tpu.memory_space<vmem>>, %arg3: memref<1x32xf32, #tpu.memory_space<vmem>>, %arg4: memref<32x170xbf16, #tpu.memory_space<vmem>>, %arg5: memref<1x170xf32, #tpu.memory_space<vmem>>, %arg6: memref<16x170xf32, #tpu.memory_space<vmem>>, %arg7: memref<16x32xbf16, #tpu.memory_space<vmem>>) attributes {dimension_semantics = [#tpu.dimension_semantics<parallel>, #tpu.dimension_semantics<arbitrary>], iteration_bounds = array<i64: 1, 1>, scalar_prefetch = 0 : i64, scratch_operands = 1 : i64, tpu.core_type = #tpu.core_type<tc>, window_params = [{transform_indices = @transform_0, window_bounds = array<i64: 16, 32>}, {pipeline_mode = #tpu.pipeline_mode<synchronous>, transform_indices = @transform_1, window_bounds = array<i64: 1, 32>}, {transform_indices = @transform_2, window_bounds = array<i64: 32, 170>}, {transform_indices = @transform_3, window_bounds = array<i64: 1, 170>}, {transform_indices = @transform_4, window_bounds = array<i64: 16, 170>}]} {
    %c0_i32 = arith.constant 0 : i32
    %0 = arith.cmpi eq, %arg1, %c0_i32 : i32
    %1 = arith.extui %0 : i1 to i32
    %c0_i32_0 = arith.constant 0 : i32
    %2 = arith.cmpi ne, %1, %c0_i32_0 : i32
    scf.if %2 {
      %c0_8 = arith.constant 0 : index
      %c0_9 = arith.constant 0 : index
      %10 = vector.load %arg2[%c0_8, %c0_9] : memref<16x32xf32, #tpu.memory_space<vmem>>, vector<16x32xf32>
      %11 = arith.mulf %10, %10 : vector<16x32xf32>
      %cst_10 = arith.constant dense<0.000000e+00> : vector<16xf32>
      %12 = vector.multi_reduction <add>, %11, %cst_10 [1] : vector<16x32xf32> to vector<16xf32>
      %13 = vector.shape_cast %12 : vector<16xf32> to vector<16x1xf32>
      %14 = math.sqrt %13 : vector<16x1xf32>
      %cst_11 = arith.constant 9.99999996E-13 : f32
      %15 = vector.broadcast %cst_11 : f32 to vector<16x1xf32>
      %16 = arith.maximumf %14, %15 : vector<16x1xf32>
      %17 = vector.broadcast %16 : vector<16x1xf32> to vector<16x32xf32>
      %18 = arith.divf %10, %17 : vector<16x32xf32>
      %cst_12 = arith.constant 5.65685415 : f32
      %19 = vector.broadcast %cst_12 : f32 to vector<16x32xf32>
      %20 = arith.mulf %18, %19 : vector<16x32xf32>
      %c0_13 = arith.constant 0 : index
      %c0_14 = arith.constant 0 : index
      %21 = vector.load %arg3[%c0_13, %c0_14] : memref<1x32xf32, #tpu.memory_space<vmem>>, vector<1x32xf32>
      %22 = vector.broadcast %21 : vector<1x32xf32> to vector<16x32xf32>
      %23 = arith.mulf %20, %22 : vector<16x32xf32>
      %24 = arith.truncf %23 : vector<16x32xf32> to vector<16x32xbf16>
      %c0_15 = arith.constant 0 : index
      %c0_16 = arith.constant 0 : index
      %25 = vector.load %arg7[%c0_15, %c0_16] : memref<16x32xbf16, #tpu.memory_space<vmem>>, vector<16x32xbf16>
      tpu.vector_store %arg7[%c0_15, %c0_16], %24 {strides = array<i32>} : memref<16x32xbf16, #tpu.memory_space<vmem>>, vector<16x32xbf16>,
    } else {
    }
    %c0 = arith.constant 0 : index
    %c0_1 = arith.constant 0 : index
    %3 = vector.load %arg7[%c0, %c0_1] : memref<16x32xbf16, #tpu.memory_space<vmem>>, vector<16x32xbf16>
    %c0_2 = arith.constant 0 : index
    %c0_3 = arith.constant 0 : index
    %4 = vector.load %arg4[%c0_2, %c0_3] : memref<32x170xbf16, #tpu.memory_space<vmem>>, vector<32x170xbf16>
    %cst = arith.constant dense<0.000000e+00> : vector<16x170xf32>
    %5 = tpu.matmul %3, %4, %cst {dimension_numbers = #tpu.dot_dimension_numbers<[1], [0], [0], [1], [0, 0, 1, 1], [], []>} : vector<16x32xbf16>, vector<32x170xbf16>, vector<16x170xf32> -> vector<16x170xf32>
    %c0_4 = arith.constant 0 : index
    %c0_5 = arith.constant 0 : index
    %6 = vector.load %arg5[%c0_4, %c0_5] : memref<1x170xf32, #tpu.memory_space<vmem>>, vector<1x170xf32>
    %7 = vector.broadcast %6 : vector<1x170xf32> to vector<16x170xf32>
    %8 = arith.addf %5, %7 : vector<16x170xf32>
    %c0_6 = arith.constant 0 : index
    %c0_7 = arith.constant 0 : index
    %9 = vector.load %arg6[%c0_6, %c0_7] : memref<16x170xf32, #tpu.memory_space<vmem>>, vector<16x170xf32>
    tpu.vector_store %arg6[%c0_6, %c0_7], %8 {strides = array<i32>} : memref<16x170xf32, #tpu.memory_space<vmem>>, vector<16x170xf32>,
    return
  }
  func.func @transform_0(%arg0: i32, %arg1: i32) -> (i32, i32) {
    %c0_i32 = arith.constant 0 : i32
    %c0_i32_0 = arith.constant 0 : i32
    return %arg0, %c0_i32 : i32, i32
  }
  func.func @transform_1(%arg0: i32, %arg1: i32) -> (i32, i32) {
    %c0_i32 = arith.constant 0 : i32
    %c0_i32_0 = arith.constant 0 : i32
    %c0_i32_1 = arith.constant 0 : i32
    return %c0_i32, %c0_i32_0 : i32, i32
  }
  func.func @transform_2(%arg0: i32, %arg1: i32) -> (i32, i32) {
    %c0_i32 = arith.constant 0 : i32
    %c0_i32_0 = arith.constant 0 : i32
    return %c0_i32, %arg1 : i32, i32
  }
  func.func @transform_3(%arg0: i32, %arg1: i32) -> (i32, i32) {
    %c0_i32 = arith.constant 0 : i32
    %c0_i32_0 = arith.constant 0 : i32
    return %c0_i32, %arg1 : i32, i32
  }
  func.func @transform_4(%arg0: i32, %arg1: i32) -> (i32, i32) {
    %c0_i32 = arith.constant 0 : i32
    return %arg0, %arg1 : i32, i32
  }
}

module attributes {stable_mosaic.version = 11 : i64} {
  func.func @_rms_linear_kernel(%arg0: i32, %arg1: i32, %arg2: memref<16x32xf32, #tpu.memory_space<vmem>>, %arg3: memref<1x32xf32, #tpu.memory_space<vmem>>, %arg4: memref<32x64xbf16, #tpu.memory_space<vmem>>, %arg5: memref<1x64xf32, #tpu.memory_space<vmem>>, %arg6: memref<16x64xf32, #tpu.memory_space<vmem>>, %arg7: memref<16x32xbf16, #tpu.memory_space<vmem>>) attributes {dimension_semantics = [#tpu.dimension_semantics<parallel>, #tpu.dimension_semantics<arbitrary>], iteration_bounds = array<i64: 1, 1>, scalar_prefetch = 0 : i64, scratch_operands = 1 : i64, tpu.core_type = #tpu.core_type<tc>, window_params = [{transform_indices = @transform_0, window_bounds = array<i64: 16, 32>}, {pipeline_mode = #tpu.pipeline_mode<synchronous>, transform_indices = @transform_1, window_bounds = array<i64: 1, 32>}, {transform_indices = @transform_2, window_bounds = array<i64: 32, 64>}, {transform_indices = @transform_3, window_bounds = array<i64: 1, 64>}, {transform_indices = @transform_4, window_bounds = array<i64: 16, 64>}]} {
    %c0_i32 = arith.constant 0 : i32
    %0 = arith.cmpi eq, %arg1, %c0_i32 : i32
    %1 = arith.extui %0 : i1 to i32
    %c0_i32_0 = arith.constant 0 : i32
    %2 = arith.cmpi ne, %1, %c0_i32_0 : i32
    scf.if %2 {
      %c0_8 = arith.constant 0 : index
      %c0_9 = arith.constant 0 : index
      %10 = vector.load %arg2[%c0_8, %c0_9] : memref<16x32xf32, #tpu.memory_space<vmem>>, vector<16x32xf32>
      %11 = arith.mulf %10, %10 : vector<16x32xf32>
      %cst_10 = arith.constant dense<0.000000e+00> : vector<16xf32>
      %12 = vector.multi_reduction <add>, %11, %cst_10 [1] : vector<16x32xf32> to vector<16xf32>
      %13 = vector.shape_cast %12 : vector<16xf32> to vector<16x1xf32>
      %14 = math.sqrt %13 : vector<16x1xf32>
      %cst_11 = arith.constant 9.99999996E-13 : f32
      %15 = vector.broadcast %cst_11 : f32 to vector<16x1xf32>
      %16 = arith.maximumf %14, %15 : vector<16x1xf32>
      %17 = vector.broadcast %16 : vector<16x1xf32> to vector<16x32xf32>
      %18 = arith.divf %10, %17 : vector<16x32xf32>
      %cst_12 = arith.constant 5.65685415 : f32
      %19 = vector.broadcast %cst_12 : f32 to vector<16x32xf32>
      %20 = arith.mulf %18, %19 : vector<16x32xf32>
      %c0_13 = arith.constant 0 : index
      %c0_14 = arith.constant 0 : index
      %21 = vector.load %arg3[%c0_13, %c0_14] : memref<1x32xf32, #tpu.memory_space<vmem>>, vector<1x32xf32>
      %22 = vector.broadcast %21 : vector<1x32xf32> to vector<16x32xf32>
      %23 = arith.mulf %20, %22 : vector<16x32xf32>
      %24 = arith.truncf %23 : vector<16x32xf32> to vector<16x32xbf16>
      %c0_15 = arith.constant 0 : index
      %c0_16 = arith.constant 0 : index
      %25 = vector.load %arg7[%c0_15, %c0_16] : memref<16x32xbf16, #tpu.memory_space<vmem>>, vector<16x32xbf16>
      tpu.vector_store %arg7[%c0_15, %c0_16], %24 {strides = array<i32>} : memref<16x32xbf16, #tpu.memory_space<vmem>>, vector<16x32xbf16>,
    } else {
    }
    %c0 = arith.constant 0 : index
    %c0_1 = arith.constant 0 : index
    %3 = vector.load %arg7[%c0, %c0_1] : memref<16x32xbf16, #tpu.memory_space<vmem>>, vector<16x32xbf16>
    %c0_2 = arith.constant 0 : index
    %c0_3 = arith.constant 0 : index
    %4 = vector.load %arg4[%c0_2, %c0_3] : memref<32x64xbf16, #tpu.memory_space<vmem>>, vector<32x64xbf16>
    %cst = arith.constant dense<0.000000e+00> : vector<16x64xf32>
    %5 = tpu.matmul %3, %4, %cst {dimension_numbers = #tpu.dot_dimension_numbers<[1], [0], [0], [1], [0, 0, 1, 1], [], []>} : vector<16x32xbf16>, vector<32x64xbf16>, vector<16x64xf32> -> vector<16x64xf32>
    %c0_4 = arith.constant 0 : index
    %c0_5 = arith.constant 0 : index
    %6 = vector.load %arg5[%c0_4, %c0_5] : memref<1x64xf32, #tpu.memory_space<vmem>>, vector<1x64xf32>
    %7 = vector.broadcast %6 : vector<1x64xf32> to vector<16x64xf32>
    %8 = arith.addf %5, %7 : vector<16x64xf32>
    %c0_6 = arith.constant 0 : index
    %c0_7 = arith.constant 0 : index
    %9 = vector.load %arg6[%c0_6, %c0_7] : memref<16x64xf32, #tpu.memory_space<vmem>>, vector<16x64xf32>
    tpu.vector_store %arg6[%c0_6, %c0_7], %8 {strides = array<i32>} : memref<16x64xf32, #tpu.memory_space<vmem>>, vector<16x64xf32>,
    return
  }
  func.func @transform_0(%arg0: i32, %arg1: i32) -> (i32, i32) {
    %c0_i32 = arith.constant 0 : i32
    %c0_i32_0 = arith.constant 0 : i32
    return %arg0, %c0_i32 : i32, i32
  }
  func.func @transform_1(%arg0: i32, %arg1: i32) -> (i32, i32) {
    %c0_i32 = arith.constant 0 : i32
    %c0_i32_0 = arith.constant 0 : i32
    %c0_i32_1 = arith.constant 0 : i32
    return %c0_i32, %c0_i32_0 : i32, i32
  }
  func.func @transform_2(%arg0: i32, %arg1: i32) -> (i32, i32) {
    %c0_i32 = arith.constant 0 : i32
    %c0_i32_0 = arith.constant 0 : i32
    return %c0_i32, %arg1 : i32, i32
  }
  func.func @transform_3(%arg0: i32, %arg1: i32) -> (i32, i32) {
    %c0_i32 = arith.constant 0 : i32
    %c0_i32_0 = arith.constant 0 : i32
    return %c0_i32, %arg1 : i32, i32
  }
  func.func @transform_4(%arg0: i32, %arg1: i32) -> (i32, i32) {
    %c0_i32 = arith.constant 0 : i32
    return %arg0, %arg1 : i32, i32
  }
}

module attributes {stable_mosaic.version = 11 : i64} {
  func.func @_linear_residual_kernel(%arg0: i32, %arg1: i32, %arg2: i32, %arg3: memref<16x85xbf16, #tpu.memory_space<vmem>>, %arg4: memref<85x32xbf16, #tpu.memory_space<vmem>>, %arg5: memref<1x32xf32, #tpu.memory_space<vmem>>, %arg6: memref<16x32xf32, #tpu.memory_space<vmem>>, %arg7: memref<16x32xf32, #tpu.memory_space<vmem>>) attributes {dimension_semantics = [#tpu.dimension_semantics<parallel>, #tpu.dimension_semantics<parallel>, #tpu.dimension_semantics<arbitrary>], iteration_bounds = array<i64: 1, 1, 1>, scalar_prefetch = 0 : i64, scratch_operands = 0 : i64, tpu.core_type = #tpu.core_type<tc>, window_params = [{transform_indices = @transform_0, window_bounds = array<i64: 16, 85>}, {transform_indices = @transform_1, window_bounds = array<i64: 85, 32>}, {transform_indices = @transform_2, window_bounds = array<i64: 1, 32>}, {transform_indices = @transform_3, window_bounds = array<i64: 16, 32>}, {transform_indices = @transform_4, window_bounds = array<i64: 16, 32>}]} {
    %c0_i32 = arith.constant 0 : i32
    %0 = arith.cmpi eq, %arg2, %c0_i32 : i32
    %1 = arith.extui %0 : i1 to i32
    %c0_i32_0 = arith.constant 0 : i32
    %2 = arith.cmpi ne, %1, %c0_i32_0 : i32
    scf.if %2 {
      %cst_10 = arith.constant 0.000000e+00 : f32
      %12 = vector.broadcast %cst_10 : f32 to vector<16x32xf32>
      %c0_11 = arith.constant 0 : index
      %c0_12 = arith.constant 0 : index
      %13 = vector.load %arg7[%c0_11, %c0_12] : memref<16x32xf32, #tpu.memory_space<vmem>>, vector<16x32xf32>
      tpu.vector_store %arg7[%c0_11, %c0_12], %12 {strides = array<i32>} : memref<16x32xf32, #tpu.memory_space<vmem>>, vector<16x32xf32>,
    } else {
    }
    %c0 = arith.constant 0 : index
    %c0_1 = arith.constant 0 : index
    %3 = vector.load %arg7[%c0, %c0_1] : memref<16x32xf32, #tpu.memory_space<vmem>>, vector<16x32xf32>
    %c0_2 = arith.constant 0 : index
    %c0_3 = arith.constant 0 : index
    %4 = vector.load %arg3[%c0_2, %c0_3] : memref<16x85xbf16, #tpu.memory_space<vmem>>, vector<16x85xbf16>
    %c0_4 = arith.constant 0 : index
    %c0_5 = arith.constant 0 : index
    %5 = vector.load %arg4[%c0_4, %c0_5] : memref<85x32xbf16, #tpu.memory_space<vmem>>, vector<85x32xbf16>
    %cst = arith.constant dense<0.000000e+00> : vector<16x32xf32>
    %6 = tpu.matmul %4, %5, %cst {dimension_numbers = #tpu.dot_dimension_numbers<[1], [0], [0], [1], [0, 0, 1, 1], [], []>} : vector<16x85xbf16>, vector<85x32xbf16>, vector<16x32xf32> -> vector<16x32xf32>
    %7 = arith.addf %3, %6 : vector<16x32xf32>
    %c0_6 = arith.constant 0 : index
    %c0_7 = arith.constant 0 : index
    %8 = vector.load %arg7[%c0_6, %c0_7] : memref<16x32xf32, #tpu.memory_space<vmem>>, vector<16x32xf32>
    tpu.vector_store %arg7[%c0_6, %c0_7], %7 {strides = array<i32>} : memref<16x32xf32, #tpu.memory_space<vmem>>, vector<16x32xf32>,
    %c0_i32_8 = arith.constant 0 : i32
    %9 = arith.cmpi eq, %arg2, %c0_i32_8 : i32
    %10 = arith.extui %9 : i1 to i32
    %c0_i32_9 = arith.constant 0 : i32
    %11 = arith.cmpi ne, %10, %c0_i32_9 : i32
    scf.if %11 {
      %c0_10 = arith.constant 0 : index
      %c0_11 = arith.constant 0 : index
      %12 = vector.load %arg7[%c0_10, %c0_11] : memref<16x32xf32, #tpu.memory_space<vmem>>, vector<16x32xf32>
      %c0_12 = arith.constant 0 : index
      %c0_13 = arith.constant 0 : index
      %13 = vector.load %arg5[%c0_12, %c0_13] : memref<1x32xf32, #tpu.memory_space<vmem>>, vector<1x32xf32>
      %c0_14 = arith.constant 0 : index
      %c0_15 = arith.constant 0 : index
      %14 = vector.load %arg6[%c0_14, %c0_15] : memref<16x32xf32, #tpu.memory_space<vmem>>, vector<16x32xf32>
      %15 = vector.broadcast %13 : vector<1x32xf32> to vector<16x32xf32>
      %16 = arith.addf %15, %14 : vector<16x32xf32>
      %17 = arith.addf %12, %16 : vector<16x32xf32>
      %c0_16 = arith.constant 0 : index
      %c0_17 = arith.constant 0 : index
      %18 = vector.load %arg7[%c0_16, %c0_17] : memref<16x32xf32, #tpu.memory_space<vmem>>, vector<16x32xf32>
      tpu.vector_store %arg7[%c0_16, %c0_17], %17 {strides = array<i32>} : memref<16x32xf32, #tpu.memory_space<vmem>>, vector<16x32xf32>,
    } else {
    }
    return
  }
  func.func @transform_0(%arg0: i32, %arg1: i32, %arg2: i32) -> (i32, i32) {
    %c0_i32 = arith.constant 0 : i32
    return %arg0, %arg2 : i32, i32
  }
  func.func @transform_1(%arg0: i32, %arg1: i32, %arg2: i32) -> (i32, i32) {
    %c0_i32 = arith.constant 0 : i32
    return %arg2, %arg1 : i32, i32
  }
  func.func @transform_2(%arg0: i32, %arg1: i32, %arg2: i32) -> (i32, i32) {
    %c0_i32 = arith.constant 0 : i32
    %c0_i32_0 = arith.constant 0 : i32
    return %c0_i32, %arg1 : i32, i32
  }
  func.func @transform_3(%arg0: i32, %arg1: i32, %arg2: i32) -> (i32, i32) {
    %c0_i32 = arith.constant 0 : i32
    return %arg0, %arg1 : i32, i32
  }
  func.func @transform_4(%arg0: i32, %arg1: i32, %arg2: i32) -> (i32, i32) {
    %c0_i32 = arith.constant 0 : i32
    return %arg0, %arg1 : i32, i32
  }
}

</mosaic_0001>

<bundles_post_ra>
// kernel: infini_transformer_forward.13
= control target key start
LH: loop header
LB: loop body
LE: loop exit
PB: predicated region body
PF: predicated region fallthrough
CT: control target
= control target key end

     0   :  { %vm22_vm0 = vcmask 261120   ;;  %v111_v1 = vmov 0.0   ;;  %s192_s1 = inlined_call_operand.vmem [shape: bf16[32,32], index: 1, kind: input, shape index: {}]   ;;  %s193_s4 = inlined_call_operand.vmem [shape: f32[16,32], index: 4, kind: output, shape index: {}]   ;;  %s194_s2 = inlined_call_operand.vmem [shape: f32[1,32], index: 2, kind: input, shape index: {}]   ;;  %s195_s0 = inlined_call_operand.vmem [shape: bf16[16,32], index: 0, kind: input, shape index: {}]   ;;  %s196_s3 = inlined_call_operand.vmem [shape: f32[16,32], index: 3, kind: input, shape index: {}]  }
   0x1   :  { %v108_v0 = vld [vmem:[%s192_s1 + $0x8] sm:$0xff]  ;;  %23 = vst.msk [vmem:[%s193_s4] sm:$0xff] %vm22_vm0, %v111_v1  ;;  %v107_v2 = vld [vmem:[%s192_s1] sm:$0xff] }
   0x2   :  { %24 = vst.msk [vmem:[%s193_s4 + $0x8] sm:$0xff] %vm22_vm0, %v111_v1  ;;  %60 = vmatpush.bf16.msra.mxu0 %v108_v0  ;;  %v106_v3 = vld [vmem:[%s195_s0] sm:$0xff]  ;;  %v79_v15 = vld [vmem:[%s196_s3 + $0x8] sm:$0xff] }
   0x3   :  { %v110_v7 = vld [vmem:[%s194_s2] ss:$0 sm:$0xff] }
   0x4   :  { %v78_v8 = vld [vmem:[%s196_s3] sm:$0xff]  ;;  %v84_v16 = vadd.f32 %v110_v7, %v79_v15 }
   0x5   :  { %v83_v10 = vadd.f32 %v110_v7, %v78_v8 }
   0x6   :  { %61 = vmatpush.bf16.msra.mxu0 %v107_v2 }
   0x8   :  { %v25_v4 = vld [vmem:[%s193_s4] sm:$0xff] }
   0x9   :  { %105 = vmatmul.msk.bf16.vlgmr.msra.gmra.mxu0 %vm22_vm0, %v106_v3  ;;  %v26_v9 = vld [vmem:[%s193_s4 + $0x8] sm:$0xff] }
  0x86   :  { %v63_v5 = vpop.f32.mrf.mxu0 }
  0x87   :  { %v68_v6 = vadd.f32 %v63_v5, %v25_v4 }
  0x89   :  { %70 = vst.msk [vmem:[%s193_s4] sm:$0xff] %vm22_vm0, %v68_v6 }
  0x8e   :  { %v65_v11 = vpop.f32.mrf.mxu0 }
  0x8f   :  { %v69_v12 = vadd.f32 %v65_v11, %v26_v9 }
  0x90   :  { %v75_v13 = vld [vmem:[%s193_s4] sm:$0xff] }
  0x91   :  { %v85_v14 = vadd.f32 %v83_v10, %v75_v13  ;;  %71 = vst.msk [vmem:[%s193_s4 + $0x8] sm:$0xff] %vm22_vm0, %v69_v12 }
  0x93   :  { %87 = vst.msk [vmem:[%s193_s4] sm:$0xff] %vm22_vm0, %v85_v14 }
  0x98   :  { %v76_v17 = vld [vmem:[%s193_s4 + $0x8] sm:$0xff] }
  0x99   :  { %v86_v18 = vadd.f32 %v84_v16, %v76_v17 }
  0x9b   :  { %88 = vst.msk [vmem:[%s193_s4 + $0x8] sm:$0xff] %vm22_vm0, %v86_v18 }

// kernel: infini_transformer_forward.11
= control target key start
LH: loop header
LB: loop body
LE: loop exit
PB: predicated region body
PF: predicated region fallthrough
CT: control target
= control target key end

     0   :  { %vm26_vm0 = vcmask 261120   ;;  %vm99_vm10 = vcmask 257024   ;;  %vm147_vm14 = vcmask 785408   ;;  %s242_s0 = inlined_call_operand.vmem [shape: f32[16,32], index: 0, kind: input, shape index: {}]   ;;  %s243_s1 = inlined_call_operand.vmem [shape: f32[1,32], index: 1, kind: input, shape index: {}]   ;;  %s244_s3 = inlined_call_operand.vmem [shape: f32[1,96], index: 3, kind: input, shape index: {}]   ;;  %s245_s2 = inlined_call_operand.vmem [shape: bf16[32,96], index: 2, kind: input, shape index: {}]   ;;  %s246_s4 = inlined_call_operand.vmem [shape: f32[16,96], index: 4, kind: output, shape index: {}]  }
   0x1   :  { %v208_v0 = vld [vmem:[%s242_s0] sm:$0xff]  ;;  %v215_v2 = vld [vmem:[%s242_s0 + $0x8] sm:$0xff] }
   0x2   :  { %v24_v1 = vmul.f32 %v208_v0, %v208_v0  ;;  %v25_v4 = vmul.f32 %v215_v2, %v215_v2  ;;  %v169_v25 = vld [vmem:[%s245_s2 + $0x8] sm:$0xff]  ;;  %v168_v28 = vld [vmem:[%s245_s2] sm:$0xff] }
   0x3   :  { %139 = vmatpush.bf16.msra.mxu0 %v169_v25  ;;  %v170_v45 = vld [vmem:[%s243_s1] ss:$0 sm:$0xff] }
   0x4   :  { %v27_v3 = vsel %vm26_vm0, %v24_v1, 0.0  ;;  %v30_v5 = vsel %vm26_vm0, %v25_v4, 0.0  ;;  %v171_v62 = vld [vmem:[%s244_s3] ss:$0 sm:$0xff] }
   0x5   :  { %28 = vadd.xlane.f32.xlu0 %v27_v3 }
   0x7   :  { %140 = vmatpush.bf16.msra.mxu0 %v168_v28 }
   0xd   :  { %31 = vadd.xlane.f32.xlu0 %v30_v5 }
  0x78   :  { %v29_v6 = vpop.xlane.xlu0 %28 }
  0x79   :  { %172 = vrsqrt.f32 %v29_v6  ;;  %vm40_vm1 = vcmp.eq.f32.partialorder %v29_v6, inf  ;;  %v43_v18 = vand.u32 2147483648, %v29_v6  ;;  %vm42_vm2 = vcmp.eq.f32.partialorder %v29_v6, 0.0 }
  0x7f   :  { %v173_v7 = vpop.eup %172 }
  0x80   :  { %v34_v8 = vmul.f32 %v173_v7, %v29_v6  ;;  %v32_v9 = vpop.xlane.xlu0 %31 }
  0x81   :  { %174 = vrsqrt.f32 %v32_v9  ;;  %vm52_vm3 = vcmp.eq.f32.partialorder %v32_v9, inf  ;;  %v55_v27 = vand.u32 2147483648, %v32_v9  ;;  %vm54_vm4 = vcmp.eq.f32.partialorder %v32_v9, 0.0 }
  0x82   :  { %v35_v10 = vmul.f32 %v173_v7, %v34_v8 }
  0x84   :  { %v36_v11 = vmul.f32 0.5, %v35_v10 }
  0x86   :  { %v37_v12 = vsub.f32 1.5, %v36_v11 }
  0x87   :  { %v175_v13 = vpop.eup %174 }
  0x88   :  { %v38_v14 = vmul.f32 %v173_v7, %v37_v12  ;;  %v46_v15 = vmul.f32 %v175_v13, %v32_v9 }
  0x8a   :  { %v39_v16 = vmul.f32 %v38_v14, %v29_v6  ;;  %v47_v17 = vmul.f32 %v175_v13, %v46_v15 }
  0x8c   :  { %v41_v19 = vsel %vm40_vm1, %v29_v6, %v39_v16  ;;  %v48_v20 = vmul.f32 0.5, %v47_v17 }
  0x8d   :  { %v44_v21 = vsel %vm42_vm2, %v43_v18, %v41_v19 }
  0x8e   :  { %v57_v22 = vmax.f32 %v44_v21, 1e-12  ;;  %v49_v23 = vsub.f32 1.5, %v48_v20 }
  0x90   :  { %176 = vrcp.f32 %v57_v22  ;;  %v50_v24 = vmul.f32 %v175_v13, %v49_v23  ;;  %v70_v35 = vand.u32 2147483648, %v57_v22  ;;  %v68_v37 = vand.u32 2147483647, %v57_v22 }
  0x91   :  { %vm64_vm6 = vweird.f32 %v57_v22 }
  0x92   :  { %v51_v26 = vmul.f32 %v50_v24, %v32_v9  ;;  %v71_v39 = vor.u32 1.1754944e-38, %v70_v35  ;;  %vm69_vm8 = vcmp.eq.f32.partialorder %v68_v37, 8.507059e+37 }
  0x94   :  { %v53_v29 = vsel %vm52_vm3, %v32_v9, %v51_v26 }
  0x95   :  { %v56_v31 = vsel %vm54_vm4, %v55_v27, %v53_v29 }
  0x96   :  { %v177_v30 = vpop.eup %176  ;;  %v58_v33 = vmax.f32 %v56_v31, 1e-12 }
  0x97   :  { %v60_v32 = vmul.f32 %v177_v30, %v57_v22  ;;  %vm65_vm5 = vweird.f32 %v177_v30 }
  0x98   :  { %178 = vrcp.f32 %v58_v33  ;;  %vm66_vm7 = vmor %vm64_vm6, %vm65_vm5  ;;  %v85_v48 = vand.u32 2147483648, %v58_v33  ;;  %v83_v50 = vand.u32 2147483647, %v58_v33  ;;  %vm79_vm11 = vweird.f32 %v58_v33 }
  0x99   :  { %v61_v34 = vsub.f32 1.0, %v60_v32 }
  0x9a   :  { %v86_v54 = vor.u32 1.1754944e-38, %v85_v48  ;;  %vm84_vm13 = vcmp.eq.f32.partialorder %v83_v50, 8.507059e+37 }
  0x9b   :  { %v62_v36 = vmul.f32 %v177_v30, %v61_v34 }
  0x9d   :  { %v63_v38 = vadd.f32 %v177_v30, %v62_v36 }
  0x9e   :  { %v179_v40 = vpop.eup %178 }
  0x9f   :  { %v67_v41 = vsel %vm66_vm7, %v177_v30, %v63_v38  ;;  %v75_v43 = vmul.f32 %v179_v40, %v58_v33  ;;  %vm80_vm9 = vweird.f32 %v179_v40 }
  0xa0   :  { %v72_v42 = vsel %vm69_vm8, %v71_v39, %v67_v41  ;;  %vm81_vm12 = vmor %vm79_vm11, %vm80_vm9 }
  0xa1   :  { %v73_v44 = vmul.f32 %v72_v42, %v208_v0  ;;  %v76_v46 = vsub.f32 1.0, %v75_v43 }
  0xa3   :  { %v89_v47 = vmul.f32 5.656854, %v73_v44  ;;  %v77_v49 = vmul.f32 %v179_v40, %v76_v46 }
  0xa5   :  { %v95_v51 = vmul.f32 %v170_v45, %v89_v47  ;;  %v78_v52 = vadd.f32 %v179_v40, %v77_v49 }
  0xa7   :  { %v97_v53 = vpack.c.bf16 %v95_v51, %v95_v51  ;;  %v82_v55 = vsel %vm81_vm12, %v179_v40, %v78_v52 }
  0xa8   :  { %v87_v56 = vsel %vm84_vm13, %v86_v54, %v82_v55 }
  0xa9   :  { %100 = vst.msk [vmem:[#allocation2] sm:$0xf] %vm99_vm10, %v97_v53  ;;  %v88_v57 = vmul.f32 %v87_v56, %v215_v2 }
  0xab   :  { %v90_v58 = vmul.f32 5.656854, %v88_v57 }
  0xad   :  { %v96_v59 = vmul.f32 %v170_v45, %v90_v58 }
  0xaf   :  { %v98_v60 = vpack.c.bf16 %v96_v59, %v96_v59 }
  0xb1   :  { %101 = vst.msk [vmem:[#allocation2 + $0x4] sm:$0xf] %vm99_vm10, %v98_v60 }
  0xb8   :  { %v167_v61 = vld [vmem:[#allocation2] sm:$0xff] }
  0xb9   :  { %166 = vmatmul.msk.bf16.vlgmr.msra.gmra.mxu0 %vm26_vm0, %v167_v61 }
 0x136   :  { %v142_v63 = vpop.f32.mrf.mxu0 }
 0x137   :  { %v143_v0 = vadd.f32 %v171_v62, %v142_v63 }
 0x139   :  { %148 = vst.msk [vmem:[%s246_s4] sm:$0xff] %vm147_vm14, %v143_v0 }
 0x13e   :  { %v144_v1 = vpop.f32.mrf.mxu0 }
 0x13f   :  { %v145_v2 = vadd.f32 %v171_v62, %v144_v1 }
 0x141   :  { %149 = vst.msk [vmem:[%s246_s4 + $0x8] sm:$0xff] %vm147_vm14, %v145_v2 }

// kernel: infini_transformer_forward.12
= control target key start
LH: loop header
LB: loop body
LE: loop exit
PB: predicated region body
PF: predicated region fallthrough
CT: control target
= control target key end

     0   :  { %s703_s12 = smov 0   ;;  %s705_s13 = smov 0   ;;  %s759_s0 = inlined_call_operand.vmem [shape: bf16[4,8,16], index: 0, kind: input, shape index: {}]   ;;  %s760_s1 = inlined_call_operand.vmem [shape: bf16[4,8,16], index: 1, kind: input, shape index: {}]   ;;  %s761_s2 = inlined_call_operand.vmem [shape: bf16[4,8,16], index: 2, kind: input, shape index: {}]   ;;  %s762_s3 = inlined_call_operand.vmem [shape: bf16[4,8,16], index: 3, kind: output, shape index: {}]  }
   0x1   :  { %s707_s14 = smov 0  }
   0x2 LB: > { %s32_s15 = sadd.s32 1, %s674_s13  ;;  %p609_p0 = scmp.ge.s32.totalorder %s678_s14, 1  ;;  %s678_s14 = sphi %s707_s14, %s13_s14   ;;  %s674_s13 = sphi %s705_s13, %s764_s13   ;;  %s670_s12 = sphi %s703_s12, %s763_s12  }
   0x3   : > { %p34_p1 = scmp.ge.s32.totalorder %s32_s15, 4  ;;  %p206_p2 = scmp.lt.s32.totalorder %s678_s14, 5 }
   0x5   : > { %s766_s15 = smov (%p34_p1, %s32_s15), 0  ;;  %p207_p3 = pnand %p609_p0, %p206_p2 }
   0x6   : > { %p252_p4 = scmp.lt.s32.totalorder (!%p207_p3), %s670_s12, 3 }
   0x7   : > { %210 = sbr.rel (%p207_p3) target bundleno = 660 (0x294), region = 32 }
   0xc   : > { %vm293_vm0 = vcmask 7168   ;;  %v680_v0 = vmov 0.0   ;;  %vm296_vm1 = vcmask 130048   ;;  %s768_s12 = smov (!%p252_p4, %s670_s12), 3  ;;  %v681_v4 = vmov -inf  }
   0xd   : > { %295 = vst.msk [vmem:[#allocation3] sm:$0xff] %vm293_vm0, %v680_v0  ;;  %s723_s16 = sshll.u32 %s768_s12, 2  ;;  %v385_v5 = vlaneseq  ;;  %vm414_vm3 = vcmask 64512   ;;  %v682_v12 = vmov 0   ;;  %vm450_vm4 = vcmask 1043456  }
   0xe   : > { %297 = vst.msk [vmem:[#allocation4] sm:$0xff] %vm296_vm1, %v680_v0  ;;  %s267_s19 = scalar_lea.vmem %s760_s1, %s723_s16  ;;  %s258_s22 = scalar_lea.vmem %s759_s0, %s723_s16  ;;  %647 = vset.pattern.permute.xlu0 %v682_v12  ;;  %649 = vset.pattern.permute.xlu2 %v682_v12  ;;  %vm496_vm9 = vcmask 125952  }
   0xf   : > { %v391_v1 = vld [vmem:[%s267_s19] sm:$0xf]  ;;  %294 = vst.msk [vmem:[#allocation2] sm:$0xff] %vm293_vm0, %v681_v4  ;;  %v386_v6 = vshrl.u32 %v385_v5, 7  ;;  %v388_v7 = vand.u32 127, %v385_v5  ;;  %648 = vset.pattern.permute.xlu1 %v682_v12  ;;  %s278_s25 = scalar_lea.vmem %s761_s2, %s723_s16  ;;  %s287_s28 = scalar_lea.vmem %s762_s3, %s723_s16 }
  0x10   : > { %v397_v2 = vsel %vm296_vm1, %v391_v1, 0  ;;  %v390_v3 = vld [vmem:[%s258_s22] sm:$0xf] }
  0x11   : > { %406 = vmatpush.bf16.xpose.msra.mxu0 %v397_v2  ;;  %vm389_vm2 = vcmp.le.s32.totalorder %v388_v7, %v386_v6  ;;  %v446_v19 = vld [vmem:[%s278_s25] sm:$0xf] }
  0x12   : > { %v452_v20 = vsel %vm450_vm4, %v446_v19, 0 }
  0x13   : > { %461 = vmatpush.bf16.msra.mxu1 %v452_v20 }
  0x14   : > { %v430_v27 = vld [vmem:[#allocation3] sm:$0xff] }
  0x15   : > { %v438_v31 = vld [vmem:[#allocation4] sm:$0xff] }
  0x16   : > { %v413_v13 = vld [vmem:[#allocation2] sm:$0xff] }
  0x18   : > { %616 = vmatmul.msk.bf16.vlgmr.msra.gmra.mxu0 %vm296_vm1, %v390_v3 }
  0x95   : > { %v408_v8 = vpop.f32.mrf.mxu0 }
  0x96   : > { %v412_v9 = vsel %vm389_vm2, %v408_v8, -3.4028235e+38 }
  0x97   : > { %v415_v10 = vsel %vm414_vm3, %v412_v9, -inf }
  0x98   : > { %416 = vmax.xlane.f32.xlu0 %v415_v10 }
  0x9d   : > { %v410_v11 = vpop.f32.mrf.mxu0 }
 0x10b   : > { %v417_v14 = vpop.xlane.xlu0 %416 }
 0x10c   : > { %v418_v15 = vmax.f32 %v413_v13, %v417_v14 }
 0x10e   : > { %v419_v16 = vsub.f32 %v413_v13, %v418_v15  ;;  %469 = vst.msk [vmem:[#allocation2] sm:$0xff] %vm293_vm0, %v418_v15  ;;  %424 = vperm.xlu0 %647, %v418_v15  }
 0x110   : > { %v420_v17 = vmul.f32 1.442695, %v419_v16 }
 0x112   : > { %650 = vpow2.f32 %v420_v17 }
 0x118   : > { %v651_v18 = vpop.eup %650 }
 0x119   : > { %441 = vperm.xlu2 %649, %v651_v18   ;;  %v431_v28 = vmul.f32 %v651_v18, %v430_v27 }
 0x173   : > { %v442_v32 = vpop.permute.xlu2 %441 }
 0x174   : > { %v444_v33 = vmul.f32 %v442_v32, %v438_v31 }
 0x180   : > { %v425_v21 = vpop.permute.xlu0 %424 }
 0x181   : > { %v427_v22 = vsub.f32 %v412_v9, %v425_v21 }
 0x183   : > { %v428_v23 = vmul.f32 1.442695, %v427_v22 }
 0x185   : > { %652 = vpow2.f32 %v428_v23 }
 0x18b   : > { %v653_v24 = vpop.eup %652 }
 0x18c   : > { %v432_v25 = vsel %vm414_vm3, %v653_v24, 0.0  ;;  %v445_v26 = vpack.c.bf16 %v653_v24, %v653_v24 }
 0x18d   : > { %433 = vadd.xlane.f32.xlu1 %v432_v25 }
 0x18e   : > { %617 = vmatmul.msk.bf16.vlgmr.msra.gmra.mxu1 %vm414_vm3, %v445_v26 }
 0x200   : > { %v434_v29 = vpop.xlane.xlu1 %433 }
 0x201   : > { %v435_v30 = vadd.f32 %v434_v29, %v431_v28 }
 0x203   : > { %437 = vst.msk [vmem:[#allocation3] sm:$0xff] %vm293_vm0, %v435_v30 }
 0x20a   : > { %v474_v34 = vld [vmem:[#allocation3] sm:$0xff] }
 0x20b   : > { %v463_v35 = vpop.f32.mrf.mxu1  ;;  %477 = vperm.xlu1 %648, %v474_v34  }
 0x20c   : > { %v467_v36 = vadd.f32 %v463_v35, %v444_v33 }
 0x20e   : > { %468 = vst.msk [vmem:[#allocation4] sm:$0xff] %vm296_vm1, %v467_v36 }
 0x213   : > { %v465_v37 = vpop.f32.mrf.mxu1 }
 0x215   : > { %v473_v48 = vld [vmem:[#allocation4] sm:$0xff] }
 0x27d   : > { %v478_v38 = vpop.permute.xlu1 %477 }
 0x27e   : > { %654 = vrcp.f32 %v478_v38  ;;  %v491_v42 = vand.u32 2147483648, %v478_v38  ;;  %v489_v44 = vand.u32 2147483647, %v478_v38  ;;  %vm485_vm6 = vweird.f32 %v478_v38 }
 0x280   : > { %v492_v46 = vor.u32 1.1754944e-38, %v491_v42  ;;  %vm490_vm8 = vcmp.eq.f32.partialorder %v489_v44, 8.507059e+37 }
 0x284   : > { %v655_v39 = vpop.eup %654 }
 0x285   : > { %v481_v40 = vmul.f32 %v655_v39, %v478_v38  ;;  %vm486_vm5 = vweird.f32 %v655_v39 }
 0x286   : > { %vm487_vm7 = vmor %vm485_vm6, %vm486_vm5 }
 0x287   : > { %v482_v41 = vsub.f32 1.0, %v481_v40 }
 0x289   : > { %v483_v43 = vmul.f32 %v655_v39, %v482_v41 }
 0x28b   : > { %v484_v45 = vadd.f32 %v655_v39, %v483_v43 }
 0x28d   : > { %v488_v47 = vsel %vm487_vm7, %v655_v39, %v484_v45 }
 0x28e   : > { %v493_v49 = vsel %vm490_vm8, %v492_v46, %v488_v47 }
 0x28f   : > { %v494_v50 = vmul.f32 %v493_v49, %v473_v48 }
 0x291   : > { %v495_v51 = vpack.c.bf16 %v494_v50, %v494_v50 }
 0x293   : > { %497 = vst.msk [vmem:[%s287_s28] sm:$0xf] %vm496_vm9, %v495_v51 }
 0x294 PF: > { %s13_s14 = sadd.s32 1, %s678_s14   ;;  %s763_s12 = smov %s674_s13 }
 0x295   : > { %p10_p5 = scmp.ge.s32.totalorder %s13_s14, 6   ;;  %s764_s13 = smov %s766_s15 }
 0x297   :  { %12 = sbr.rel (!%p10_p5) target bundleno = 2 (0x2), region = 84 }

// kernel: infini_transformer_forward.14
= control target key start
LH: loop header
LB: loop body
LE: loop exit
PB: predicated region body
PF: predicated region fallthrough
CT: control target
= control target key end

     0   :  { %vm26_vm0 = vcmask 261120   ;;  %vm99_vm10 = vcmask 257024   ;;  %vm172_vm14 = vcmask 343040   ;;  %s303_s0 = inlined_call_operand.vmem [shape: f32[16,32], index: 0, kind: input, shape index: {}]   ;;  %s304_s1 = inlined_call_operand.vmem [shape: f32[1,32], index: 1, kind: input, shape index: {}]   ;;  %s305_s2 = inlined_call_operand.vmem [shape: bf16[32,170], index: 2, kind: input, shape index: {}]   ;;  %s306_s3 = inlined_call_operand.vmem [shape: f32[1,170], index: 3, kind: input, shape index: {}]   ;;  %s307_s4 = inlined_call_operand.vmem [shape: f32[16,170], index: 4, kind: output, shape index: {}]  }
   0x1   :  { %v244_v0 = vld [vmem:[%s303_s0] sm:$0xff]  ;;  %v251_v2 = vld [vmem:[%s303_s0 + $0x8] sm:$0xff]  ;;  %v194_v26 = vld [vmem:[%s305_s2 + $0x10] sm:$0xf] }
   0x2   :  { %v24_v1 = vmul.f32 %v244_v0, %v244_v0  ;;  %v25_v4 = vmul.f32 %v251_v2, %v251_v2  ;;  %v206_v27 = vld [vmem:[%s305_s2 + $0x14] sm:$0xf0]  ;;  %v205_v30 = vld [vmem:[%s305_s2 + $0x14] sm:$0xf]  ;;  %v196_v31 = vld [vmem:[%s305_s2 + $0x18] sm:$0xf0] }
   0x3   :  { %v195_v29 = vor.u32 %v206_v27, %v194_v26  ;;  %v186_v32 = vld [vmem:[%s305_s2] sm:$0xf]  ;;  %v199_v33 = vor.u32 %v205_v30, %v196_v31  ;;  %v204_v34 = vld [vmem:[%s305_s2 + $0x4] sm:$0xf0]  ;;  %v203_v35 = vld [vmem:[%s305_s2 + $0x4] sm:$0xf] }
   0x4   :  { %v27_v3 = vsel %vm26_vm0, %v24_v1, 0.0  ;;  %v30_v5 = vsel %vm26_vm0, %v25_v4, 0.0  ;;  %v188_v36 = vld [vmem:[%s305_s2 + $0x8] sm:$0xf0]  ;;  %v187_v38 = vor.u32 %v204_v34, %v186_v32  ;;  %v207_v55 = vld [vmem:[%s304_s1] ss:$0 sm:$0xff] }
   0x5   :  { %28 = vadd.xlane.f32.xlu0 %v27_v3  ;;  %149 = vmatpush.bf16.msra.mxu0 %v195_v29  ;;  %v191_v41 = vor.u32 %v203_v35, %v188_v36 }
   0x6   :  { %163 = vmatpush.bf16.msra.mxu1 %v199_v33 }
   0x9   :  { %150 = vmatpush.bf16.msra.mxu0 %v187_v38 }
   0xa   :  { %164 = vmatpush.bf16.msra.mxu1 %v191_v41 }
   0xd   :  { %31 = vadd.xlane.f32.xlu0 %v30_v5 }
  0x78   :  { %v29_v6 = vpop.xlane.xlu0 %28 }
  0x79   :  { %208 = vrsqrt.f32 %v29_v6  ;;  %vm40_vm1 = vcmp.eq.f32.partialorder %v29_v6, inf  ;;  %v43_v18 = vand.u32 2147483648, %v29_v6  ;;  %vm42_vm2 = vcmp.eq.f32.partialorder %v29_v6, 0.0 }
  0x7f   :  { %v209_v7 = vpop.eup %208 }
  0x80   :  { %v34_v8 = vmul.f32 %v209_v7, %v29_v6  ;;  %v32_v9 = vpop.xlane.xlu0 %31 }
  0x81   :  { %210 = vrsqrt.f32 %v32_v9  ;;  %vm52_vm3 = vcmp.eq.f32.partialorder %v32_v9, inf  ;;  %v55_v25 = vand.u32 2147483648, %v32_v9  ;;  %vm54_vm4 = vcmp.eq.f32.partialorder %v32_v9, 0.0 }
  0x82   :  { %v35_v10 = vmul.f32 %v209_v7, %v34_v8 }
  0x84   :  { %v36_v11 = vmul.f32 0.5, %v35_v10 }
  0x86   :  { %v37_v12 = vsub.f32 1.5, %v36_v11 }
  0x87   :  { %v211_v13 = vpop.eup %210 }
  0x88   :  { %v38_v14 = vmul.f32 %v209_v7, %v37_v12  ;;  %v46_v15 = vmul.f32 %v211_v13, %v32_v9 }
  0x8a   :  { %v39_v16 = vmul.f32 %v38_v14, %v29_v6  ;;  %v47_v17 = vmul.f32 %v211_v13, %v46_v15 }
  0x8c   :  { %v41_v19 = vsel %vm40_vm1, %v29_v6, %v39_v16  ;;  %v48_v20 = vmul.f32 0.5, %v47_v17 }
  0x8d   :  { %v44_v21 = vsel %vm42_vm2, %v43_v18, %v41_v19 }
  0x8e   :  { %v57_v22 = vmax.f32 %v44_v21, 1e-12  ;;  %v49_v23 = vsub.f32 1.5, %v48_v20 }
  0x90   :  { %212 = vrcp.f32 %v57_v22  ;;  %v50_v24 = vmul.f32 %v211_v13, %v49_v23  ;;  %v70_v45 = vand.u32 2147483648, %v57_v22  ;;  %v68_v47 = vand.u32 2147483647, %v57_v22 }
  0x91   :  { %vm64_vm6 = vweird.f32 %v57_v22 }
  0x92   :  { %v51_v28 = vmul.f32 %v50_v24, %v32_v9  ;;  %v71_v49 = vor.u32 1.1754944e-38, %v70_v45  ;;  %vm69_vm8 = vcmp.eq.f32.partialorder %v68_v47, 8.507059e+37 }
  0x94   :  { %v53_v37 = vsel %vm52_vm3, %v32_v9, %v51_v28  ;;  %v108_v9 = vld [vmem:[%s306_s3] sm:$0x3] }
  0x95   :  { %v56_v40 = vsel %vm54_vm4, %v55_v25, %v53_v37  ;;  %v110_v10 = vperm.slane %v108_v9, 0  ;;  %v111_v11 = vperm.slane %v108_v9, 1 }
  0x96   :  { %v213_v39 = vpop.eup %212  ;;  %v58_v43 = vmax.f32 %v56_v40, 1e-12 }
  0x97   :  { %v60_v42 = vmul.f32 %v213_v39, %v57_v22  ;;  %vm65_vm5 = vweird.f32 %v213_v39 }
  0x98   :  { %214 = vrcp.f32 %v58_v43  ;;  %vm66_vm7 = vmor %vm64_vm6, %vm65_vm5  ;;  %v85_v58 = vand.u32 2147483648, %v58_v43  ;;  %v83_v60 = vand.u32 2147483647, %v58_v43  ;;  %vm79_vm11 = vweird.f32 %v58_v43 }
  0x99   :  { %v61_v44 = vsub.f32 1.0, %v60_v42 }
  0x9a   :  { %v86_v1 = vor.u32 1.1754944e-38, %v85_v58  ;;  %vm84_vm13 = vcmp.eq.f32.partialorder %v83_v60, 8.507059e+37 }
  0x9b   :  { %v62_v46 = vmul.f32 %v213_v39, %v61_v44 }
  0x9d   :  { %v63_v48 = vadd.f32 %v213_v39, %v62_v46 }
  0x9e   :  { %v215_v50 = vpop.eup %214 }
  0x9f   :  { %v67_v51 = vsel %vm66_vm7, %v213_v39, %v63_v48  ;;  %v75_v53 = vmul.f32 %v215_v50, %v58_v43  ;;  %vm80_vm9 = vweird.f32 %v215_v50 }
  0xa0   :  { %v72_v52 = vsel %vm69_vm8, %v71_v49, %v67_v51  ;;  %vm81_vm12 = vmor %vm79_vm11, %vm80_vm9 }
  0xa1   :  { %v73_v54 = vmul.f32 %v72_v52, %v244_v0  ;;  %v76_v56 = vsub.f32 1.0, %v75_v53 }
  0xa3   :  { %v89_v57 = vmul.f32 5.656854, %v73_v54  ;;  %v77_v59 = vmul.f32 %v215_v50, %v76_v56 }
  0xa5   :  { %v95_v61 = vmul.f32 %v207_v55, %v89_v57  ;;  %v78_v62 = vadd.f32 %v215_v50, %v77_v59 }
  0xa7   :  { %v97_v63 = vpack.c.bf16 %v95_v61, %v95_v61  ;;  %v82_v3 = vsel %vm81_vm12, %v215_v50, %v78_v62 }
  0xa8   :  { %v87_v0 = vsel %vm84_vm13, %v86_v1, %v82_v3 }
  0xa9   :  { %100 = vst.msk [vmem:[#allocation2] sm:$0xf] %vm99_vm10, %v97_v63  ;;  %v88_v4 = vmul.f32 %v87_v0, %v251_v2 }
  0xab   :  { %v90_v5 = vmul.f32 5.656854, %v88_v4 }
  0xad   :  { %v96_v6 = vmul.f32 %v207_v55, %v90_v5 }
  0xaf   :  { %v98_v7 = vpack.c.bf16 %v96_v6, %v96_v6 }
  0xb1   :  { %101 = vst.msk [vmem:[#allocation2 + $0x4] sm:$0xf] %vm99_vm10, %v98_v7 }
  0xb8   :  { %v202_v8 = vld [vmem:[#allocation2] sm:$0xff] }
  0xb9   :  { %200 = vmatmul.msk.bf16.vlgmr.msra.gmra.mxu0 %vm26_vm0, %v202_v8  ;;  %201 = vmatmul.msk.bf16.vlgmr.msra.gmra.mxu1 %vm26_vm0, %v202_v8 }
 0x136   :  { %v152_v12 = vpop.f32.mrf.mxu0  ;;  %v166_v13 = vpop.f32.mrf.mxu1 }
 0x137   :  { %v153_v14 = vadd.f32 %v152_v12, %v110_v10  ;;  %v167_v15 = vadd.f32 %v166_v13, %v111_v11 }
 0x139   :  { %171 = vst [vmem:[%s307_s4] sm:$0xff] %v153_v14 }
 0x13a   :  { %173 = vst.msk [vmem:[%s307_s4 + $0x8] sm:$0xff] %vm172_vm14, %v167_v15 }
 0x13e   :  { %v154_v2 = vpop.f32.mrf.mxu0  ;;  %v168_v16 = vpop.f32.mrf.mxu1 }
 0x13f   :  { %v155_v17 = vadd.f32 %v154_v2, %v110_v10  ;;  %v169_v18 = vadd.f32 %v168_v16, %v111_v11 }
 0x141   :  { %174 = vst [vmem:[%s307_s4 + $0x10] sm:$0xff] %v155_v17 }
 0x142   :  { %175 = vst.msk [vmem:[%s307_s4 + $0x18] sm:$0xff] %vm172_vm14, %v169_v18 }

// kernel: infini_transformer_forward.21
= control target key start
LH: loop header
LB: loop body
LE: loop exit
PB: predicated region body
PF: predicated region fallthrough
CT: control target
= control target key end

     0   :  { %vm27_vm0 = vcmask 261120   ;;  %s281_s0 = inlined_call_operand.vmem [shape: f32[16,32], index: 0, kind: input, shape index: {}]   ;;  %s282_s1 = inlined_call_operand.vmem [shape: f32[1,32], index: 1, kind: input, shape index: {}]   ;;  %s283_s2 = inlined_call_operand.vmem [shape: bf16[32,64], index: 2, kind: input, shape index: {}]   ;;  %s284_s3 = inlined_call_operand.vmem [shape: f32[1,64], index: 3, kind: input, shape index: {}]   ;;  %s285_s4 = inlined_call_operand.hbm [shape: f32[16,64], index: 4, kind: output, shape index: {}]  }
   0x1   :  { %v23_v0 = vld [vmem:[%s281_s0] sm:$0xff] }
   0x2   :  { %v25_v1 = vmul.f32 %v23_v0, %v23_v0 }
   0x3   :  { %9 = vsyncpa [#allocation4], 0  ;;  %v258_v2 = vld [vmem:[%s281_s0 + $0x8] sm:$0xff]  ;;  %v183_v28 = vld [vmem:[%s283_s2] sm:$0xff]  ;;  %vm100_vm10 = vcmask 257024   ;;  %vm148_vm14 = vcmask 523264  }
   0x4   :  { %v28_v3 = vsel %vm27_vm0, %v25_v1, 0.0  ;;  %v26_v4 = vmul.f32 %v258_v2, %v258_v2  ;;  %v184_v25 = vld [vmem:[%s283_s2 + $0x8] sm:$0xff]  ;;  %v188_v45 = vld [vmem:[%s282_s1] ss:$0 sm:$0xff]  ;;  %s224_s24 = smov [#allocation3]   ;;  %s157_s28 = sshll.u32 %s285_s4, 4  ;;  %s158_s28 = int_to_ptr.hbm [resolvable:$true] %s157_s28 }
   0x5   :  { %29 = vadd.xlane.f32.xlu0 %v28_v3  ;;  %140 = vmatpush.bf16.msra.mxu0 %v184_v25  ;;  %v189_v62 = vld [vmem:[%s284_s3] ss:$0 sm:$0xff]  ;;  %s155_s25 = sshll.u32 %s224_s24, 4  ;;  %s225_s29 = smov 128   ;;  %s156_s25 = int_to_ptr.vmem [resolvable:$true] %s155_s25 }
   0x6   :  { %v31_v5 = vsel %vm27_vm0, %v26_v4, 0.0  ;;  %s226_s30 = smov 8  }
   0x9   :  { %141 = vmatpush.bf16.msra.mxu0 %v183_v28 }
   0xd   :  { %32 = vadd.xlane.f32.xlu0 %v31_v5 }
  0x78   :  { %v30_v6 = vpop.xlane.xlu0 %29 }
  0x79   :  { %190 = vrsqrt.f32 %v30_v6  ;;  %vm41_vm1 = vcmp.eq.f32.partialorder %v30_v6, inf  ;;  %v44_v18 = vand.u32 2147483648, %v30_v6  ;;  %vm43_vm2 = vcmp.eq.f32.partialorder %v30_v6, 0.0 }
  0x7f   :  { %v191_v7 = vpop.eup %190 }
  0x80   :  { %v35_v8 = vmul.f32 %v191_v7, %v30_v6  ;;  %v33_v9 = vpop.xlane.xlu0 %32 }
  0x81   :  { %192 = vrsqrt.f32 %v33_v9  ;;  %vm53_vm3 = vcmp.eq.f32.partialorder %v33_v9, inf  ;;  %v56_v27 = vand.u32 2147483648, %v33_v9  ;;  %vm55_vm4 = vcmp.eq.f32.partialorder %v33_v9, 0.0 }
  0x82   :  { %v36_v10 = vmul.f32 %v191_v7, %v35_v8 }
  0x84   :  { %v37_v11 = vmul.f32 0.5, %v36_v10 }
  0x86   :  { %v38_v12 = vsub.f32 1.5, %v37_v11 }
  0x87   :  { %v193_v13 = vpop.eup %192 }
  0x88   :  { %v39_v14 = vmul.f32 %v191_v7, %v38_v12  ;;  %v47_v15 = vmul.f32 %v193_v13, %v33_v9 }
  0x8a   :  { %v40_v16 = vmul.f32 %v39_v14, %v30_v6  ;;  %v48_v17 = vmul.f32 %v193_v13, %v47_v15 }
  0x8c   :  { %v42_v19 = vsel %vm41_vm1, %v30_v6, %v40_v16  ;;  %v49_v20 = vmul.f32 0.5, %v48_v17 }
  0x8d   :  { %v45_v21 = vsel %vm43_vm2, %v44_v18, %v42_v19 }
  0x8e   :  { %v58_v22 = vmax.f32 %v45_v21, 1e-12  ;;  %v50_v23 = vsub.f32 1.5, %v49_v20 }
  0x90   :  { %194 = vrcp.f32 %v58_v22  ;;  %v51_v24 = vmul.f32 %v193_v13, %v50_v23  ;;  %v71_v35 = vand.u32 2147483648, %v58_v22  ;;  %v69_v37 = vand.u32 2147483647, %v58_v22 }
  0x91   :  { %vm65_vm6 = vweird.f32 %v58_v22 }
  0x92   :  { %v52_v26 = vmul.f32 %v51_v24, %v33_v9  ;;  %v72_v39 = vor.u32 1.1754944e-38, %v71_v35  ;;  %vm70_vm8 = vcmp.eq.f32.partialorder %v69_v37, 8.507059e+37 }
  0x94   :  { %v54_v29 = vsel %vm53_vm3, %v33_v9, %v52_v26 }
  0x95   :  { %v57_v31 = vsel %vm55_vm4, %v56_v27, %v54_v29 }
  0x96   :  { %v195_v30 = vpop.eup %194  ;;  %v59_v33 = vmax.f32 %v57_v31, 1e-12 }
  0x97   :  { %v61_v32 = vmul.f32 %v195_v30, %v58_v22  ;;  %vm66_vm5 = vweird.f32 %v195_v30 }
  0x98   :  { %196 = vrcp.f32 %v59_v33  ;;  %vm67_vm7 = vmor %vm65_vm6, %vm66_vm5  ;;  %v86_v48 = vand.u32 2147483648, %v59_v33  ;;  %v84_v50 = vand.u32 2147483647, %v59_v33  ;;  %vm80_vm11 = vweird.f32 %v59_v33 }
  0x99   :  { %v62_v34 = vsub.f32 1.0, %v61_v32 }
  0x9a   :  { %v87_v54 = vor.u32 1.1754944e-38, %v86_v48  ;;  %vm85_vm13 = vcmp.eq.f32.partialorder %v84_v50, 8.507059e+37 }
  0x9b   :  { %v63_v36 = vmul.f32 %v195_v30, %v62_v34 }
  0x9d   :  { %v64_v38 = vadd.f32 %v195_v30, %v63_v36 }
  0x9e   :  { %v197_v40 = vpop.eup %196 }
  0x9f   :  { %v68_v41 = vsel %vm67_vm7, %v195_v30, %v64_v38  ;;  %v76_v43 = vmul.f32 %v197_v40, %v59_v33  ;;  %vm81_vm9 = vweird.f32 %v197_v40 }
  0xa0   :  { %v73_v42 = vsel %vm70_vm8, %v72_v39, %v68_v41  ;;  %vm82_vm12 = vmor %vm80_vm11, %vm81_vm9 }
  0xa1   :  { %v74_v44 = vmul.f32 %v73_v42, %v23_v0  ;;  %v77_v46 = vsub.f32 1.0, %v76_v43 }
  0xa3   :  { %v90_v47 = vmul.f32 5.656854, %v74_v44  ;;  %v78_v49 = vmul.f32 %v197_v40, %v77_v46 }
  0xa5   :  { %v96_v51 = vmul.f32 %v188_v45, %v90_v47  ;;  %v79_v52 = vadd.f32 %v197_v40, %v78_v49 }
  0xa7   :  { %v98_v53 = vpack.c.bf16 %v96_v51, %v96_v51  ;;  %v83_v55 = vsel %vm82_vm12, %v197_v40, %v79_v52 }
  0xa8   :  { %v88_v56 = vsel %vm85_vm13, %v87_v54, %v83_v55 }
  0xa9   :  { %101 = vst.msk [vmem:[#allocation2] sm:$0xf] %vm100_vm10, %v98_v53  ;;  %v89_v57 = vmul.f32 %v88_v56, %v258_v2 }
  0xab   :  { %v91_v58 = vmul.f32 5.656854, %v89_v57 }
  0xad   :  { %v97_v59 = vmul.f32 %v188_v45, %v91_v58 }
  0xaf   :  { %v99_v60 = vpack.c.bf16 %v97_v59, %v97_v59 }
  0xb1   :  { %102 = vst.msk [vmem:[#allocation2 + $0x4] sm:$0xf] %vm100_vm10, %v99_v60 }
  0xb8   :  { %v182_v61 = vld [vmem:[#allocation2] sm:$0xff] }
  0xb9   :  { %181 = vmatmul.msk.bf16.vlgmr.msra.gmra.mxu0 %vm27_vm0, %v182_v61 }
 0x136   :  { %v143_v63 = vpop.f32.mrf.mxu0 }
 0x137   :  { %v144_v0 = vadd.f32 %v189_v62, %v143_v63 }
 0x139   :  { %149 = vst.msk [vmem:[#allocation3] sm:$0xff] %vm148_vm14, %v144_v0 }
 0x13e   :  { %v145_v1 = vpop.f32.mrf.mxu0 }
 0x13f   :  { %v146_v2 = vadd.f32 %v189_v62, %v145_v1 }
 0x141   :  { %150 = vst.msk [vmem:[#allocation3 + $0x8] sm:$0xff] %vm148_vm14, %v146_v2 }
 0x142   :  { %163 = dma.vmem_to_hbm [thread:$0]  %s156_s25, 256, %s158_s28, [#allocation4], %s225_s29, %s225_s29, %s226_s30  }
 0x143   :  { %222 = dma.done.wait [#allocation4], 256  }
 0x144   :  { %223 = vsyncadd [#allocation4], 4294967040 }
 0x145   :  { %168 = vsyncpa [#allocation4], 1 }

// kernel: infini_transformer_forward.15
= control target key start
LH: loop header
LB: loop body
LE: loop exit
PB: predicated region body
PF: predicated region fallthrough
CT: control target
= control target key end

     0   :  { %vm82_vm0 = vcmask 1041408   ;;  %vm83_vm1 = vcmask 1042432   ;;  %v163_v1 = vmov 65535   ;;  %vm22_vm2 = vcmask 261120   ;;  %s256_s1 = inlined_call_operand.vmem [shape: bf16[85,32], index: 1, kind: input, shape index: {}]   ;;  %s257_s4 = inlined_call_operand.vmem [shape: f32[16,32], index: 4, kind: output, shape index: {}]   ;;  %s258_s2 = inlined_call_operand.vmem [shape: f32[1,32], index: 2, kind: input, shape index: {}]   ;;  %s259_s0 = inlined_call_operand.vmem [shape: bf16[16,85], index: 0, kind: input, shape index: {}]   ;;  %s260_s3 = inlined_call_operand.vmem [shape: f32[16,32], index: 3, kind: input, shape index: {}]  }
   0x1   :  { %v39_v0 = vld [vmem:[%s256_s1 + $0x28] sm:$0x7]  ;;  %v84_v2 = vsel %vm82_vm0, 4294967295, %v163_v1  ;;  %v164_v5 = vmov 0.0   ;;  %v159_v8 = vld [vmem:[%s256_s1 + $0x20] sm:$0xff]  ;;  %v158_v9 = vld [vmem:[%s256_s1 + $0x18] sm:$0xff] }
   0x2   :  { %v66_v3 = vunpack.c.l.b16 %v39_v0  ;;  %v85_v4 = vsel %vm83_vm1, %v84_v2, 0  ;;  %23 = vst.msk [vmem:[%s257_s4] sm:$0xff] %vm22_vm2, %v164_v5  ;;  %v157_v10 = vld [vmem:[%s256_s1 + $0x10] sm:$0xff]  ;;  %v156_v11 = vld [vmem:[%s256_s1 + $0x8] sm:$0xff]  ;;  %v155_v12 = vld [vmem:[%s256_s1] sm:$0xff]  ;;  %vm78_vm3 = vcmask 695296  }
   0x3   :  { %24 = vst.msk [vmem:[%s257_s4 + $0x8] sm:$0xff] %vm22_vm2, %v164_v5  ;;  %v154_v13 = vld [vmem:[%s259_s0] sm:$0xff]  ;;  %v115_v25 = vld [vmem:[%s260_s3 + $0x8] sm:$0xff] }
   0x4   :  { %v72_v6 = vpack.c.b16 %v66_v3, %v66_v3  ;;  %v162_v17 = vld [vmem:[%s258_s2] ss:$0 sm:$0xff] }
   0x5   :  { %v114_v18 = vld [vmem:[%s260_s3] sm:$0xff]  ;;  %v120_v26 = vadd.f32 %v162_v17, %v115_v25 }
   0x6   :  { %v87_v7 = vand.u32 %v85_v4, %v72_v6  ;;  %v119_v20 = vadd.f32 %v162_v17, %v114_v18 }
   0x8   :  { %91 = vmatpush.bf16.msra.mxu0 %v87_v7 }
   0x9   :  { %v25_v14 = vld [vmem:[%s257_s4] sm:$0xff] }
   0xa   :  { %v26_v19 = vld [vmem:[%s257_s4 + $0x8] sm:$0xff] }
   0xc   :  { %92 = vmatpush.bf16.msra.mxu0 %v159_v8 }
  0x10   :  { %93 = vmatpush.bf16.msra.mxu0 %v158_v9 }
  0x14   :  { %94 = vmatpush.bf16.msra.mxu0 %v157_v10 }
  0x18   :  { %95 = vmatpush.bf16.msra.mxu0 %v156_v11 }
  0x1c   :  { %96 = vmatpush.bf16.msra.mxu0 %v155_v12 }
  0x1f   :  { %153 = vmatmul.msk.bf16.vlgmr.msra.gmra.mxu0 %vm78_vm3, %v154_v13 }
  0x9c   :  { %v98_v15 = vpop.f32.mrf.mxu0 }
  0x9d   :  { %v103_v16 = vadd.f32 %v98_v15, %v25_v14 }
  0x9f   :  { %106 = vst.msk [vmem:[%s257_s4] sm:$0xff] %vm22_vm2, %v103_v16 }
  0xa4   :  { %v100_v21 = vpop.f32.mrf.mxu0 }
  0xa5   :  { %v104_v22 = vadd.f32 %v100_v21, %v26_v19 }
  0xa6   :  { %v111_v23 = vld [vmem:[%s257_s4] sm:$0xff] }
  0xa7   :  { %v121_v24 = vadd.f32 %v119_v20, %v111_v23  ;;  %107 = vst.msk [vmem:[%s257_s4 + $0x8] sm:$0xff] %vm22_vm2, %v104_v22 }
  0xa9   :  { %123 = vst.msk [vmem:[%s257_s4] sm:$0xff] %vm22_vm2, %v121_v24 }
  0xae   :  { %v112_v27 = vld [vmem:[%s257_s4 + $0x8] sm:$0xff] }
  0xaf   :  { %v122_v28 = vadd.f32 %v120_v26, %v112_v27 }
  0xb1   :  { %124 = vst.msk [vmem:[%s257_s4 + $0x8] sm:$0xff] %vm22_vm2, %v122_v28 }

</bundles_post_ra>
